<compile_context>
chip_gen: v5e
topology: v5e:2x2
jax: 0.10.0
libtpu: 0.0.40
codegen_flags: <defaults>
</compile_context>

<pallas_src>
import functools

import jax
import jax.numpy as jnp
from jax import lax
from jax.experimental import pallas as pl
from jax.experimental.pallas import tpu as pltpu


LANES = 128                      # channels are padded onto the 128-lane axis
VMEM_LIMIT = 32 * 1024 * 1024
BN_EPS = 1e-5


def _pick_tile(n, candidates):
    for c in candidates:
        if c <= n and n % c == 0:
            return c
    return 1


# ---------------------------------------------------------------------------
# Pass 1 kernel: KxK conv (K*K shifted MXU matmuls) + per-tile BN partial stats
# ---------------------------------------------------------------------------
def _conv_stats_kernel(x_ref, w_ref, pre_ref, st_ref, *, K, th, W, Cp):
    """x_ref : (1, 1, th+2p, W+2p, Cp) spatially padded input tile (halo included)
       w_ref : (K*K, Cp, Cp)           w[kh*K+kw, ci, co]
       pre_ref: (1, th, W, Cp)         pre-BN conv output tile
       st_ref : (1, 1, 2, Cp)          [sum ; sum-of-squares] over this tile's rows
    """
    xw = x_ref[0, 0]                                       # (th+2p, W+2p, Cp)
    acc = jnp.zeros((th * W, Cp), jnp.float32)
    for kh in range(K):
        for kw in range(K):
            win = xw[kh:kh + th, kw:kw + W, :].reshape(th * W, Cp)
            acc = acc + jnp.dot(win, w_ref[kh * K + kw],
                                preferred_element_type=jnp.float32)
    pre_ref[...] = acc.reshape(1, th, W, Cp)
    s1 = jnp.sum(acc, axis=0, keepdims=True)               # (1, Cp)
    s2 = jnp.sum(acc * acc, axis=0, keepdims=True)         # (1, Cp)
    st_ref[...] = jnp.concatenate([s1, s2], axis=0).reshape(1, 1, 2, Cp)


# ---------------------------------------------------------------------------
# Pass 2 kernel: fused BN affine (folded scale/shift) + ReLU, row-tiled
# ---------------------------------------------------------------------------
def _bn_relu_kernel(z_ref, sc_ref, sh_ref, o_ref):
    o_ref[...] = jnp.maximum(z_ref[...] * sc_ref[...] + sh_ref[...], 0.0)


def _conv_bn_relu_stage(x_nhwc, wmat, gamma_p, beta_p, K):
    """x_nhwc: (N, H, W, Cp) channel-padded NHWC activation -> same shape out."""
    N, H, W, Cp = x_nhwc.shape
    p = K // 2
    th = _pick_tile(H, (8, 4, 2, 1))
    n_ht = H // th

    # TODO(synk): the K//2 halo is provided by a wrapper-side overlapped re-tiling
    # (pad + stack, ~(1+2p/th)x input duplication); an in-kernel halo exchange
    # would remove this extra HBM pass.
    xpad = jnp.pad(x_nhwc, ((0, 0), (p, p), (p, p), (0, 0)))
    xh = jnp.stack([xpad[:, i * th:i * th + th + 2 * p] for i in range(n_ht)],
                   axis=1)                                  # (N, n_ht, th+2p, W+2p, Cp)

    kernel = functools.partial(_conv_stats_kernel, K=K, th=th, W=W, Cp=Cp)
    pre, part = pl.pallas_call(
        kernel,
        out_shape=(jax.ShapeDtypeStruct((N, H, W, Cp), jnp.float32),
                   jax.ShapeDtypeStruct((N, n_ht, 2, Cp), jnp.float32)),
        grid=(N, n_ht),
        in_specs=[
            pl.BlockSpec((1, 1, th + 2 * p, W + 2 * p, Cp),
                         lambda n, i: (n, i, 0, 0, 0)),
            pl.BlockSpec((K * K, Cp, Cp), lambda n, i: (0, 0, 0)),
        ],
        out_specs=(
            pl.BlockSpec((1, th, W, Cp), lambda n, i: (n, i, 0, 0)),
            pl.BlockSpec((1, 1, 2, Cp), lambda n, i: (n, i, 0, 0)),
        ),
        compiler_params=pltpu.CompilerParams(
            dimension_semantics=("parallel", "parallel"),
            vmem_limit_bytes=VMEM_LIMIT),
    )(xh, wmat)

    # Fold training-mode BN (biased variance) into per-channel scale/shift (tiny math).
    M = N * H * W
    sums = jnp.sum(part, axis=(0, 1))                       # (2, Cp)
    mean = sums[0] / M
    var = jnp.maximum(sums[1] / M - mean * mean, 0.0)
    inv = lax.rsqrt(var + BN_EPS)
    scale = (gamma_p * inv)[None, :]                        # (1, Cp)
    shift = (beta_p - mean * gamma_p * inv)[None, :]        # (1, Cp)

    tm = _pick_tile(M, (512, 256, 128, 64, 32, 16, 8, 4, 2, 1))
    y = pl.pallas_call(
        _bn_relu_kernel,
        out_shape=jax.ShapeDtypeStruct((M, Cp), jnp.float32),
        grid=(M // tm,),
        in_specs=[pl.BlockSpec((tm, Cp), lambda i: (i, 0)),
                  pl.BlockSpec((1, Cp), lambda i: (0, 0)),
                  pl.BlockSpec((1, Cp), lambda i: (0, 0))],
        out_specs=pl.BlockSpec((tm, Cp), lambda i: (i, 0)),
        compiler_params=pltpu.CompilerParams(
            dimension_semantics=("parallel",),
            vmem_limit_bytes=VMEM_LIMIT),
    )(pre.reshape(M, Cp), scale, shift)
    return y.reshape(N, H, W, Cp)


# ---------------------------------------------------------------------------
# 2x2 MaxPool with PyTorch-style flat (h*W + w) argmax indices
# ---------------------------------------------------------------------------
def _maxpool_kernel(x_ref, pool_ref, idx_ref, *, W_full, tph):
    x = x_ref[0]                                            # (tph, 2, Wo, 2, Cp)
    a = x[:, 0, :, 0, :]
    b = x[:, 0, :, 1, :]
    c = x[:, 1, :, 0, :]
    d = x[:, 1, :, 1, :]
    shp = a.shape
    ho = lax.broadcasted_iota(jnp.int32, shp, 0) + pl.program_id(1) * tph
    wo = lax.broadcasted_iota(jnp.int32, shp, 1)
    base = 2 * ho * W_full + 2 * wo
    ia, ib, ic, id_ = base, base + 1, base + W_full, base + W_full + 1
    m1 = jnp.maximum(a, b)
    i1 = jnp.where(b > a, ib, ia)
    m2 = jnp.maximum(c, d)
    i2 = jnp.where(d > c, id_, ic)
    m = jnp.maximum(m1, m2)
    ii = jnp.where(m2 > m1, i2, i1)
    pool_ref[...] = m[None]
    idx_ref[...] = ii[None]


def _maxpool2x2_with_indices(y_nhwc):
    N, H, W, Cp = y_nhwc.shape
    Ho, Wo = H // 2, W // 2
    tph = _pick_tile(Ho, (8, 4, 2, 1))
    y6 = y_nhwc.reshape(N, Ho, 2, Wo, 2, Cp)                # metadata-only reshape
    kernel = functools.partial(_maxpool_kernel, W_full=W, tph=tph)
    pooled, idx = pl.pallas_call(
        kernel,
        out_shape=(jax.ShapeDtypeStruct((N, Ho, Wo, Cp), jnp.float32),
                   jax.ShapeDtypeStruct((N, Ho, Wo, Cp), jnp.int32)),
        grid=(N, Ho // tph),
        in_specs=[pl.BlockSpec((1, tph, 2, Wo, 2, Cp),
                               lambda n, i: (n, i, 0, 0, 0, 0))],
        out_specs=(pl.BlockSpec((1, tph, Wo, Cp), lambda n, i: (n, i, 0, 0)),
                   pl.BlockSpec((1, tph, Wo, Cp), lambda n, i: (n, i, 0, 0))),
        compiler_params=pltpu.CompilerParams(
            dimension_semantics=("parallel", "parallel"),
            vmem_limit_bytes=VMEM_LIMIT),
    )(y6)
    return pooled, idx


# ---------------------------------------------------------------------------
# DownConv3 forward (NCHW in, NCHW out like the PyTorch module)
# ---------------------------------------------------------------------------
def down_conv3_forward(x_nchw, kern_p, K, chout, Cp=LANES):
    N, chin, H, W = x_nchw.shape
    x = jnp.transpose(x_nchw, (0, 2, 3, 1))                 # NCHW -> NHWC
    x = jnp.pad(x, ((0, 0), (0, 0), (0, 0), (0, Cp - chin)))
    y = x
    for s in range(3):
        y = _conv_bn_relu_stage(y, kern_p['w'][s], kern_p['g'][s], kern_p['b'][s], K)
    pool_shape = (N, chout, H, W)
    pooled, idx = _maxpool2x2_with_indices(y)
    pooled = jnp.transpose(pooled[..., :chout], (0, 3, 1, 2))
    idx = jnp.transpose(idx[..., :chout], (0, 3, 1, 2))     # int32 (PyTorch uses int64)
    return pooled, idx, pool_shape


# ---------------------------------------------------------------------------
# Deterministic parameter init (PyTorch-shaped + kernel-shaped views)
# ---------------------------------------------------------------------------
def init_params(key, chin, chout, K, Cp=LANES):
    ks = jax.random.split(key, 9)
    w1 = jax.random.normal(ks[0], (chout, chin, K, K), jnp.float32) * 0.3
    w2 = jax.random.normal(ks[1], (chout, chout, K, K), jnp.float32) * 0.3
    w3 = jax.random.normal(ks[2], (chout, chout, K, K), jnp.float32) * 0.3
    g = [1.0 + 0.1 * jax.random.normal(ks[3 + i], (chout,), jnp.float32) for i in range(3)]
    b = [0.1 * jax.random.normal(ks[6 + i], (chout,), jnp.float32) for i in range(3)]
    torch_p = dict(w=[w1, w2, w3], g=g, b=b)

    def to_kernel_w(w):
        co, ci = w.shape[0], w.shape[1]
        wm = jnp.transpose(w, (2, 3, 1, 0)).reshape(K * K, ci, co)  # w[tap, ci, co]
        return jnp.pad(wm, ((0, 0), (0, Cp - ci), (0, Cp - co)))

    def pad_vec(v):
        return jnp.pad(v, (0, Cp - v.shape[0]))

    kern_p = dict(w=[to_kernel_w(w) for w in (w1, w2, w3)],
                  g=[pad_vec(x) for x in g],
                  b=[pad_vec(x) for x in b])
    return torch_p, kern_p


# ---------------------------------------------------------------------------
# Pure-JAX reference (independent path via lax.conv_general_dilated)
# ---------------------------------------------------------------------------
def reference_forward(x, tp, K):
    p = K // 2

    def conv(z, w):
        return lax.conv_general_dilated(
            z, w, (1, 1), [(p, p), (p, p)],
            dimension_numbers=('NCHW', 'OIHW', 'NCHW'),
            precision=lax.Precision.HIGHEST)

    def bn_relu(z, g, bb):
        m = z.mean(axis=(0, 2, 3), keepdims=True)
        v = ((z - m) ** 2).mean(axis=(0, 2, 3), keepdims=True)
        z = (z - m) * lax.rsqrt(v + BN_EPS)
        return jnp.maximum(z * g[None, :, None, None] + bb[None, :, None, None], 0.0)

    y = x
    for s in range(3):
        y = bn_relu(conv(y, tp['w'][s]), tp['g'][s], tp['b'][s])
    pool_shape = y.shape
    N, C, H, W = y.shape
    yr = y.reshape(N, C, H // 2, 2, W // 2, 2).transpose(0, 1, 2, 4, 3, 5)
    yr = yr.reshape(N, C, H // 2, W // 2, 4)
    pooled = yr.max(axis=-1)
    am = jnp.argmax(yr, axis=-1)
    dh, dw = am // 2, am % 2
    hh = jnp.arange(H // 2)[None, None, :, None] * 2 + dh
    ww = jnp.arange(W // 2)[None, None, None, :] * 2 + dw
    idx = (hh * W + ww).astype(jnp.int32)
    return pooled, idx, pool_shape, y


if __name__ == "__main__":
    key = jax.random.PRNGKey(0)
    N, chin, chout, K = 2, 4, 8, 3
    H = W = 16

    kx, kp = jax.random.split(key)
    x = jax.random.normal(kx, (N, chin, H, W), jnp.float32)
    torch_p, kern_p = init_params(kp, chin, chout, K)

    pooled, idx, pool_shape = down_conv3_forward(x, kern_p, K, chout)
    pooled, idx = jax.block_until_ready((pooled, idx))

    ref_pooled, ref_idx, ref_pool_shape, ref_prepool = reference_forward(x, torch_p, K)

    assert pooled.shape == (N, chout, H // 2, W // 2), pooled.shape
    assert idx.shape == (N, chout, H // 2, W // 2), idx.shape
    assert tuple(pool_shape) == tuple(ref_pool_shape) == (N, chout, H, W)
    assert jnp.allclose(pooled, ref_pooled, atol=2e-2, rtol=2e-2), \
        float(jnp.max(jnp.abs(pooled - ref_pooled)))

    # Index validity: gathering the reference pre-pool activation at the kernel's
    # indices must reproduce the reference pooled maxima (robust to near-tie argmax
    # flips caused by tiny floating-point differences between the two conv paths).
    flat = ref_prepool.reshape(N, chout, H * W)
    gathered = jnp.take_along_axis(flat, idx.reshape(N, chout, -1), axis=2)
    gathered = gathered.reshape(ref_pooled.shape)
    assert jnp.allclose(gathered, ref_pooled, atol=5e-2, rtol=5e-2)
    assert float(jnp.mean((idx == ref_idx).astype(jnp.float32))) > 0.97

    print("KERNEL_OK")
</pallas_src>

<mosaic_0001>
module attributes {stable_mosaic.version = 11 : i64} {
  func.func @_conv_stats_kernel(%arg0: i32, %arg1: i32, %arg2: memref<1x1x10x18x128xf32, #tpu.memory_space<vmem>>, %arg3: memref<9x128x128xf32, #tpu.memory_space<vmem>>, %arg4: memref<1x8x16x128xf32, #tpu.memory_space<vmem>>, %arg5: memref<1x1x2x128xf32, #tpu.memory_space<vmem>>) attributes {dimension_semantics = [#tpu.dimension_semantics<parallel>, #tpu.dimension_semantics<parallel>], iteration_bounds = array<i64: 2, 2>, scalar_prefetch = 0 : i64, scratch_operands = 0 : i64, tpu.core_type = #tpu.core_type<tc>, window_params = [{transform_indices = @transform_0, window_bounds = array<i64: 1, 1, 10, 18, 128>}, {pipeline_mode = #tpu.pipeline_mode<synchronous>, transform_indices = @transform_1, window_bounds = array<i64: 9, 128, 128>}, {transform_indices = @transform_2, window_bounds = array<i64: 1, 8, 16, 128>}, {transform_indices = @transform_3, window_bounds = array<i64: 1, 1, 2, 128>}]} {
    %c0 = arith.constant 0 : index
    %c0_0 = arith.constant 0 : index
    %c0_1 = arith.constant 0 : index
    %c0_2 = arith.constant 0 : index
    %c0_3 = arith.constant 0 : index
    %0 = vector.load %arg2[%c0, %c0_0, %c0_1, %c0_2, %c0_3] : memref<1x1x10x18x128xf32, #tpu.memory_space<vmem>>, vector<1x1x10x18x128xf32>
    %1 = vector.shape_cast %0 : vector<1x1x10x18x128xf32> to vector<10x18x128xf32>
    %cst = arith.constant 0.000000e+00 : f32
    %2 = vector.broadcast %cst : f32 to vector<128x128xf32>
    %3 = vector.extract_strided_slice %1 {offsets = [0, 0, 0], sizes = [8, 16, 128], strides = [1, 1, 1]} : vector<10x18x128xf32> to vector<8x16x128xf32>
    %4 = vector.shape_cast %3 : vector<8x16x128xf32> to vector<128x128xf32>
    %c0_4 = arith.constant 0 : index
    %c0_5 = arith.constant 0 : index
    %c0_6 = arith.constant 0 : index
    %5 = vector.load %arg3[%c0_4, %c0_5, %c0_6] : memref<9x128x128xf32, #tpu.memory_space<vmem>>, vector<1x128x128xf32>
    %6 = vector.shape_cast %5 : vector<1x128x128xf32> to vector<128x128xf32>
    %cst_7 = arith.constant dense<0.000000e+00> : vector<128x128xf32>
    %7 = tpu.matmul %4, %6, %cst_7 {dimension_numbers = #tpu.dot_dimension_numbers<[1], [0], [0], [1], [0, 0, 1, 1], [], []>} : vector<128x128xf32>, vector<128x128xf32>, vector<128x128xf32> -> vector<128x128xf32>
    %8 = arith.addf %2, %7 : vector<128x128xf32>
    %9 = vector.extract_strided_slice %1 {offsets = [0, 1, 0], sizes = [8, 16, 128], strides = [1, 1, 1]} : vector<10x18x128xf32> to vector<8x16x128xf32>
    %10 = vector.shape_cast %9 : vector<8x16x128xf32> to vector<128x128xf32>
    %c1 = arith.constant 1 : index
    %c0_8 = arith.constant 0 : index
    %c0_9 = arith.constant 0 : index
    %11 = vector.load %arg3[%c1, %c0_8, %c0_9] : memref<9x128x128xf32, #tpu.memory_space<vmem>>, vector<1x128x128xf32>
    %12 = vector.shape_cast %11 : vector<1x128x128xf32> to vector<128x128xf32>
    %cst_10 = arith.constant dense<0.000000e+00> : vector<128x128xf32>
    %13 = tpu.matmul %10, %12, %cst_10 {dimension_numbers = #tpu.dot_dimension_numbers<[1], [0], [0], [1], [0, 0, 1, 1], [], []>} : vector<128x128xf32>, vector<128x128xf32>, vector<128x128xf32> -> vector<128x128xf32>
    %14 = arith.addf %8, %13 : vector<128x128xf32>
    %15 = vector.extract_strided_slice %1 {offsets = [0, 2, 0], sizes = [8, 16, 128], strides = [1, 1, 1]} : vector<10x18x128xf32> to vector<8x16x128xf32>
    %16 = vector.shape_cast %15 : vector<8x16x128xf32> to vector<128x128xf32>
    %c2 = arith.constant 2 : index
    %c0_11 = arith.constant 0 : index
    %c0_12 = arith.constant 0 : index
    %17 = vector.load %arg3[%c2, %c0_11, %c0_12] : memref<9x128x128xf32, #tpu.memory_space<vmem>>, vector<1x128x128xf32>
    %18 = vector.shape_cast %17 : vector<1x128x128xf32> to vector<128x128xf32>
    %cst_13 = arith.constant dense<0.000000e+00> : vector<128x128xf32>
    %19 = tpu.matmul %16, %18, %cst_13 {dimension_numbers = #tpu.dot_dimension_numbers<[1], [0], [0], [1], [0, 0, 1, 1], [], []>} : vector<128x128xf32>, vector<128x128xf32>, vector<128x128xf32> -> vector<128x128xf32>
    %20 = arith.addf %14, %19 : vector<128x128xf32>
    %21 = vector.extract_strided_slice %1 {offsets = [1, 0, 0], sizes = [8, 16, 128], strides = [1, 1, 1]} : vector<10x18x128xf32> to vector<8x16x128xf32>
    %22 = vector.shape_cast %21 : vector<8x16x128xf32> to vector<128x128xf32>
    %c3 = arith.constant 3 : index
    %c0_14 = arith.constant 0 : index
    %c0_15 = arith.constant 0 : index
    %23 = vector.load %arg3[%c3, %c0_14, %c0_15] : memref<9x128x128xf32, #tpu.memory_space<vmem>>, vector<1x128x128xf32>
    %24 = vector.shape_cast %23 : vector<1x128x128xf32> to vector<128x128xf32>
    %cst_16 = arith.constant dense<0.000000e+00> : vector<128x128xf32>
    %25 = tpu.matmul %22, %24, %cst_16 {dimension_numbers = #tpu.dot_dimension_numbers<[1], [0], [0], [1], [0, 0, 1, 1], [], []>} : vector<128x128xf32>, vector<128x128xf32>, vector<128x128xf32> -> vector<128x128xf32>
    %26 = arith.addf %20, %25 : vector<128x128xf32>
    %27 = vector.extract_strided_slice %1 {offsets = [1, 1, 0], sizes = [8, 16, 128], strides = [1, 1, 1]} : vector<10x18x128xf32> to vector<8x16x128xf32>
    %28 = vector.shape_cast %27 : vector<8x16x128xf32> to vector<128x128xf32>
    %c4 = arith.constant 4 : index
    %c0_17 = arith.constant 0 : index
    %c0_18 = arith.constant 0 : index
    %29 = vector.load %arg3[%c4, %c0_17, %c0_18] : memref<9x128x128xf32, #tpu.memory_space<vmem>>, vector<1x128x128xf32>
    %30 = vector.shape_cast %29 : vector<1x128x128xf32> to vector<128x128xf32>
    %cst_19 = arith.constant dense<0.000000e+00> : vector<128x128xf32>
    %31 = tpu.matmul %28, %30, %cst_19 {dimension_numbers = #tpu.dot_dimension_numbers<[1], [0], [0], [1], [0, 0, 1, 1], [], []>} : vector<128x128xf32>, vector<128x128xf32>, vector<128x128xf32> -> vector<128x128xf32>
    %32 = arith.addf %26, %31 : vector<128x128xf32>
    %33 = vector.extract_strided_slice %1 {offsets = [1, 2, 0], sizes = [8, 16, 128], strides = [1, 1, 1]} : vector<10x18x128xf32> to vector<8x16x128xf32>
    %34 = vector.shape_cast %33 : vector<8x16x128xf32> to vector<128x128xf32>
    %c5 = arith.constant 5 : index
    %c0_20 = arith.constant 0 : index
    %c0_21 = arith.constant 0 : index
    %35 = vector.load %arg3[%c5, %c0_20, %c0_21] : memref<9x128x128xf32, #tpu.memory_space<vmem>>, vector<1x128x128xf32>
    %36 = vector.shape_cast %35 : vector<1x128x128xf32> to vector<128x128xf32>
    %cst_22 = arith.constant dense<0.000000e+00> : vector<128x128xf32>
    %37 = tpu.matmul %34, %36, %cst_22 {dimension_numbers = #tpu.dot_dimension_numbers<[1], [0], [0], [1], [0, 0, 1, 1], [], []>} : vector<128x128xf32>, vector<128x128xf32>, vector<128x128xf32> -> vector<128x128xf32>
    %38 = arith.addf %32, %37 : vector<128x128xf32>
    %39 = vector.extract_strided_slice %1 {offsets = [2, 0, 0], sizes = [8, 16, 128], strides = [1, 1, 1]} : vector<10x18x128xf32> to vector<8x16x128xf32>
    %40 = vector.shape_cast %39 : vector<8x16x128xf32> to vector<128x128xf32>
    %c6 = arith.constant 6 : index
    %c0_23 = arith.constant 0 : index
    %c0_24 = arith.constant 0 : index
    %41 = vector.load %arg3[%c6, %c0_23, %c0_24] : memref<9x128x128xf32, #tpu.memory_space<vmem>>, vector<1x128x128xf32>
    %42 = vector.shape_cast %41 : vector<1x128x128xf32> to vector<128x128xf32>
    %cst_25 = arith.constant dense<0.000000e+00> : vector<128x128xf32>
    %43 = tpu.matmul %40, %42, %cst_25 {dimension_numbers = #tpu.dot_dimension_numbers<[1], [0], [0], [1], [0, 0, 1, 1], [], []>} : vector<128x128xf32>, vector<128x128xf32>, vector<128x128xf32> -> vector<128x128xf32>
    %44 = arith.addf %38, %43 : vector<128x128xf32>
    %45 = vector.extract_strided_slice %1 {offsets = [2, 1, 0], sizes = [8, 16, 128], strides = [1, 1, 1]} : vector<10x18x128xf32> to vector<8x16x128xf32>
    %46 = vector.shape_cast %45 : vector<8x16x128xf32> to vector<128x128xf32>
    %c7 = arith.constant 7 : index
    %c0_26 = arith.constant 0 : index
    %c0_27 = arith.constant 0 : index
    %47 = vector.load %arg3[%c7, %c0_26, %c0_27] : memref<9x128x128xf32, #tpu.memory_space<vmem>>, vector<1x128x128xf32>
    %48 = vector.shape_cast %47 : vector<1x128x128xf32> to vector<128x128xf32>
    %cst_28 = arith.constant dense<0.000000e+00> : vector<128x128xf32>
    %49 = tpu.matmul %46, %48, %cst_28 {dimension_numbers = #tpu.dot_dimension_numbers<[1], [0], [0], [1], [0, 0, 1, 1], [], []>} : vector<128x128xf32>, vector<128x128xf32>, vector<128x128xf32> -> vector<128x128xf32>
    %50 = arith.addf %44, %49 : vector<128x128xf32>
    %51 = vector.extract_strided_slice %1 {offsets = [2, 2, 0], sizes = [8, 16, 128], strides = [1, 1, 1]} : vector<10x18x128xf32> to vector<8x16x128xf32>
    %52 = vector.shape_cast %51 : vector<8x16x128xf32> to vector<128x128xf32>
    %c8 = arith.constant 8 : index
    %c0_29 = arith.constant 0 : index
    %c0_30 = arith.constant 0 : index
    %53 = vector.load %arg3[%c8, %c0_29, %c0_30] : memref<9x128x128xf32, #tpu.memory_space<vmem>>, vector<1x128x128xf32>
    %54 = vector.shape_cast %53 : vector<1x128x128xf32> to vector<128x128xf32>
    %cst_31 = arith.constant dense<0.000000e+00> : vector<128x128xf32>
    %55 = tpu.matmul %52, %54, %cst_31 {dimension_numbers = #tpu.dot_dimension_numbers<[1], [0], [0], [1], [0, 0, 1, 1], [], []>} : vector<128x128xf32>, vector<128x128xf32>, vector<128x128xf32> -> vector<128x128xf32>
    %56 = arith.addf %50, %55 : vector<128x128xf32>
    %57 = vector.shape_cast %56 : vector<128x128xf32> to vector<1x8x16x128xf32>
    %c0_32 = arith.constant 0 : index
    %c0_33 = arith.constant 0 : index
    %c0_34 = arith.constant 0 : index
    %c0_35 = arith.constant 0 : index
    %58 = vector.load %arg4[%c0_32, %c0_33, %c0_34, %c0_35] : memref<1x8x16x128xf32, #tpu.memory_space<vmem>>, vector<1x8x16x128xf32>
    tpu.vector_store %arg4[%c0_32, %c0_33, %c0_34, %c0_35], %57 {strides = array<i32>} : memref<1x8x16x128xf32, #tpu.memory_space<vmem>>, vector<1x8x16x128xf32>,
    %cst_36 = arith.constant dense<0.000000e+00> : vector<128xf32>
    %59 = vector.multi_reduction <add>, %56, %cst_36 [0] : vector<128x128xf32> to vector<128xf32>
    %60 = vector.shape_cast %59 : vector<128xf32> to vector<1x128xf32>
    %61 = arith.mulf %56, %56 : vector<128x128xf32>
    %cst_37 = arith.constant dense<0.000000e+00> : vector<128xf32>
    %62 = vector.multi_reduction <add>, %61, %cst_37 [0] : vector<128x128xf32> to vector<128xf32>
    %63 = vector.shape_cast %62 : vector<128xf32> to vector<1x128xf32>
    %64 = tpu.concatenate %60, %63 in 0 : vector<1x128xf32>, vector<1x128xf32> -> vector<2x128xf32>
    %65 = vector.shape_cast %64 : vector<2x128xf32> to vector<1x1x2x128xf32>
    %c0_38 = arith.constant 0 : index
    %c0_39 = arith.constant 0 : index
    %c0_40 = arith.constant 0 : index
    %c0_41 = arith.constant 0 : index
    %66 = vector.load %arg5[%c0_38, %c0_39, %c0_40, %c0_41] : memref<1x1x2x128xf32, #tpu.memory_space<vmem>>, vector<1x1x2x128xf32>
    tpu.vector_store %arg5[%c0_38, %c0_39, %c0_40, %c0_41], %65 {strides = array<i32>} : memref<1x1x2x128xf32, #tpu.memory_space<vmem>>, vector<1x1x2x128xf32>,
    return
  }
  func.func @transform_0(%arg0: i32, %arg1: i32) -> (i32, i32, i32, i32, i32) {
    %c0_i32 = arith.constant 0 : i32
    %c0_i32_0 = arith.constant 0 : i32
    %c0_i32_1 = arith.constant 0 : i32
    %c0_i32_2 = arith.constant 0 : i32
    return %arg0, %arg1, %c0_i32, %c0_i32_0, %c0_i32_1 : i32, i32, i32, i32, i32
  }
  func.func @transform_1(%arg0: i32, %arg1: i32) -> (i32, i32, i32) {
    %c0_i32 = arith.constant 0 : i32
    %c0_i32_0 = arith.constant 0 : i32
    %c0_i32_1 = arith.constant 0 : i32
    %c0_i32_2 = arith.constant 0 : i32
    return %c0_i32, %c0_i32_0, %c0_i32_1 : i32, i32, i32
  }
  func.func @transform_2(%arg0: i32, %arg1: i32) -> (i32, i32, i32, i32) {
    %c0_i32 = arith.constant 0 : i32
    %c0_i32_0 = arith.constant 0 : i32
    %c0_i32_1 = arith.constant 0 : i32
    return %arg0, %arg1, %c0_i32, %c0_i32_0 : i32, i32, i32, i32
  }
  func.func @transform_3(%arg0: i32, %arg1: i32) -> (i32, i32, i32, i32) {
    %c0_i32 = arith.constant 0 : i32
    %c0_i32_0 = arith.constant 0 : i32
    %c0_i32_1 = arith.constant 0 : i32
    return %arg0, %arg1, %c0_i32, %c0_i32_0 : i32, i32, i32, i32
  }
}

</mosaic_0001>

<bundles_post_ra>
// kernel: tpu_custom_call.1
= control target key start
LH: loop header
LB: loop body
LE: loop exit
PB: predicated region body
PF: predicated region fallthrough
CT: control target
= control target key end

     0   :  { %9 = vsyncpa [#allocation3], 0  ;;  %s3016_s0 = inlined_call_operand.vmem [shape: f32[2,2,10,18,128], index: 0, kind: input, shape index: {}]   ;;  %s3017_s1 = inlined_call_operand.vmem [shape: f32[9,128,128], index: 1, kind: input, shape index: {}]   ;;  %s3018_s2 = inlined_call_operand.hbm [shape: f32[2,16,16,128], index: 2, kind: output, shape index: {0}]   ;;  %s3019_s3 = inlined_call_operand.hbm [shape: f32[2,2,2,128], index: 3, kind: output, shape index: {1}]  }
   0x1   :  { %11 = vsyncpa [#allocation3 + $0x1], 0 }
   0x2   :  { %12 = vsyncpa [#allocation5], 0 }
   0x3   :  { %14 = vsyncpa [#allocation5 + $0x1], 0  ;;  %s1928_s12 = smov 0   ;;  %s1930_s13 = smov 0  }
   0x4   :  { %s1932_s14 = smov 0   ;;  %s1934_s15 = smov 0  }
   0x5   :  { %s1936_s16 = smov 0   ;;  %s1938_s17 = smov 0  }
   0x6   :  { %s1940_s18 = smov 0   ;;  %s1942_s19 = smov 0  }
   0x7 LB: > { %s1499_s20 = sadd.s32 4294967295, %s1904_s19   ;;  %s1500_s21 = sadd.s32 4294967294, %s1904_s19   ;;  %s1904_s19 = sphi %s1942_s19, %s20_s19   ;;  %s1900_s18 = sphi %s1940_s18, %s3030_s18   ;;  %s1896_s17 = sphi %s1938_s17, %s3029_s17   ;;  %s1892_s16 = sphi %s1936_s16, %s3028_s16   ;;  %s1888_s15 = sphi %s1934_s15, %s3027_s15   ;;  %s1884_s14 = sphi %s1932_s14, %s3026_s14   ;;  %s1880_s13 = sphi %s1930_s13, %s3025_s13   ;;  %s1876_s12 = sphi %s1928_s12, %s3024_s12  }
   0x8   : > { %s29_s22 = sadd.s32 1, %s1896_s17  ;;  %s32_s23 = sadd.s32 1, %s1900_s18 }
   0x9   : > { %p30_p0 = scmp.ge.s32.totalorder %s29_s22, 2  ;;  %p100_p1 = scmp.ne.s32.totalorder %s1884_s14, %s1880_s13 }
   0xa   : > { %p101_p2 = scmp.eq.s32.totalorder %s1499_s20, 3  ;;  %p106_p5 = scmp.ne.s32.totalorder %s1880_s13, %s1876_s12 }
   0xb   : > { %s3032_s22 = smov (%p30_p0, %s29_s22), 0  ;;  %s3034_s23 = smov (!%p30_p0, %s32_s23), %s1900_s18 }
   0xc   : > { %s86_s24 = ssub.s32 %s1896_s17, %s3032_s22  ;;  %p1979_p3 = por %p101_p2, %p100_p1 }
   0xd   : > { %p34_p4 = scmp.ge.s32.totalorder %s3034_s23, 2  ;;  %p107_p6 = scmp.eq.s32.totalorder %s1500_s21, 3 }
   0xe   : > { %p1503_p7 = scmp.ge.s32.totalorder %s1904_s19, 1  ;;  %p168_p9 = scmp.lt.s32.totalorder %s1904_s19, 5 }
   0xf   : > { %s3036_s23 = smov (%p34_p4, %s3034_s23), 0  ;;  %p1988_p8 = por %p107_p6, %p106_p5 }
  0x10   : > { %s85_s27 = ssub.s32 %s1900_s18, %s3036_s23  ;;  %s90_s28 = sadd.s32 1, %s1884_s14 }
  0x11   : > { %s87_s29 = sor.u32 %s86_s24, %s85_s27  ;;  %p169_p10 = pnand %p1503_p7, %p168_p9 }
  0x12   : > { %p88_p11 = scmp.eq.s32.totalorder %s87_s29, 0 }
  0x13   : > { %172 = sbr.rel (%p169_p10) target bundleno = 500 (0x1f4), region = 28 }
  0x14   : > { %s1997_s30 = scalar_select %p88_p11, %s1884_s14, %s90_s28  }
  0x18   : > { %v1522_v0 = vld [vmem:[%s3017_s1 + $0xf8] sm:$0xff]  ;;  %v1521_v1 = vld [vmem:[%s3017_s1 + $0xf0] sm:$0xff]  ;;  %p201_p12 = scmp.lt.s32.totalorder %s1892_s16, 1  ;;  %p203_p13 = scmp.lt.s32.totalorder %s1888_s15, 1  ;;  %v1520_v2 = vld [vmem:[%s3017_s1 + $0xe8] sm:$0xff]  ;;  %vm281_vm0 = vcmask 1046528  }
  0x19   : > { %1646 = vmatpush.msra.mxu1 %v1522_v0  ;;  %1647 = vmatpush.msra.mxu2 %v1522_v0  ;;  %v1519_v3 = vld [vmem:[%s3017_s1 + $0xe0] sm:$0xff]  ;;  %v1518_v4 = vld [vmem:[%s3017_s1 + $0xd8] sm:$0xff]  ;;  %v1517_v5 = vld [vmem:[%s3017_s1 + $0xd0] sm:$0xff]  ;;  %vm485_vm1 = vcmask 1045504   ;;  %s1645_s27 = sshll.u32 %s1888_s15, 4  ;;  %s1641_s11 = sshll.u32 %s1892_s16, 1 }
  0x1a   : > { %1648 = vmatpush.msra.mxu3 %v1522_v0  ;;  %355 = vmatpush.msra.mxu0 %v1522_v0  ;;  %s202_s10 = scalar_select %p201_p12, %s1892_s16, 1  ;;  %v1516_v6 = vld [vmem:[%s3017_s1 + $0xc8] sm:$0xff]  ;;  %v1515_v7 = vld [vmem:[%s3017_s1 + $0xc0] sm:$0xff]  ;;  %v1514_v8 = vld [vmem:[%s3017_s1 + $0xb8] sm:$0xff] }
  0x1b   : > { %1649 = vmatpush.msra.mxu1 %v1521_v1  ;;  %1650 = vmatpush.msra.mxu2 %v1521_v1  ;;  %s204_s21 = scalar_select %p203_p13, %s1888_s15, 1  ;;  %v1513_v9 = vld [vmem:[%s3017_s1 + $0xb0] sm:$0xff]  ;;  %v1512_v10 = vld [vmem:[%s3017_s1 + $0xa8] sm:$0xff]  ;;  %v1511_v11 = vld [vmem:[%s3017_s1 + $0xa0] sm:$0xff] }
  0x1c   : > { %1651 = vmatpush.msra.mxu3 %v1521_v1  ;;  %356 = vmatpush.msra.mxu0 %v1521_v1  ;;  %s1695_s28 = smul.u32 60, %s202_s10  ;;  %v1510_v12 = vld [vmem:[%s3017_s1 + $0x98] sm:$0xff]  ;;  %v1509_v17 = vld [vmem:[%s3017_s1 + $0x90] sm:$0xff]  ;;  %v1508_v24 = vld [vmem:[%s3017_s1 + $0x88] sm:$0xff] }
  0x1d   : > { %1652 = vmatpush.msra.mxu1 %v1520_v2  ;;  %1653 = vmatpush.msra.mxu2 %v1520_v2  ;;  %s1694_s5 = smul.u32 30, %s204_s21  ;;  %v1507_v27 = vld [vmem:[%s3017_s1 + $0x80] sm:$0xff]  ;;  %v1538_v32 = vld [vmem:[%s3017_s1 + $0x178] sm:$0xff]  ;;  %v1537_v39 = vld [vmem:[%s3017_s1 + $0x170] sm:$0xff] }
  0x1e   : > { %1654 = vmatpush.msra.mxu3 %v1520_v2  ;;  %357 = vmatpush.msra.mxu0 %v1520_v2  ;;  %v256_v34 = vld [vmem:[%s3017_s1 + $0x78] sm:$0xff]  ;;  %v255_v41 = vld [vmem:[%s3017_s1 + $0x70] sm:$0xff]  ;;  %v1536_v44 = vld [vmem:[%s3017_s1 + $0x168] sm:$0xff] }
  0x1f   : > { %1655 = vmatpush.msra.mxu1 %v1519_v3  ;;  %1656 = vmatpush.msra.mxu2 %v1519_v3  ;;  %s207_s10 = sadd.s32 %s1695_s28, %s1694_s5  ;;  %v1554_v40 = vld [vmem:[%s3017_s1 + $0x1f8] sm:$0xff]  ;;  %v1553_v45 = vld [vmem:[%s3017_s1 + $0x1f0] sm:$0xff]  ;;  %v254_v47 = vld [vmem:[%s3017_s1 + $0x68] sm:$0xff]  ;;  %s1639_s28 = sshll.u32 %s1892_s16, 5 }
  0x20   : > { %1657 = vmatpush.msra.mxu3 %v1519_v3  ;;  %358 = vmatpush.msra.mxu0 %v1519_v3  ;;  %s1506_s21 = sshll.u32 %s207_s10, 3  ;;  %v1535_v49 = vld [vmem:[%s3017_s1 + $0x160] sm:$0xff]  ;;  %v1552_v50 = vld [vmem:[%s3017_s1 + $0x1e8] sm:$0xff]  ;;  %v1534_v55 = vld [vmem:[%s3017_s1 + $0x158] sm:$0xff]  ;;  %s1357_s29 = sadd.s32 %s1645_s27, %s1639_s28 }
  0x21   : > { %1658 = vmatpush.msra.mxu1 %v1518_v4  ;;  %1659 = vmatpush.msra.mxu2 %v1518_v4  ;;  %s2039_s6 = scalar_lea.vmem %s3016_s0, %s1506_s21  ;;  %v253_v52 = vld [vmem:[%s3017_s1 + $0x60] sm:$0xff]  ;;  %v252_v57 = vld [vmem:[%s3017_s1 + $0x58] sm:$0xff]  ;;  %v1533_v61 = vld [vmem:[%s3017_s1 + $0x150] sm:$0xff]  ;;  %s1640_s4 = sshll.u32 %s1357_s29, 3 }
  0x22   : > { %1660 = vmatpush.msra.mxu3 %v1518_v4  ;;  %359 = vmatpush.msra.mxu0 %v1518_v4  ;;  %v2048_v13 = vld [vmem:[%s2039_s6 + $0x30] sm:$0xff]  ;;  %v2051_v14 = vld [vmem:[%s2039_s6 + $0x38] sm:$0xff]  ;;  %v2054_v15 = vld [vmem:[%s2039_s6 + $0x60] sm:$0xff]  ;;  %s1359_s8 = scalar_lea.hbm %s3018_s2, %s1640_s4  ;;  %s1798_s4 = scalar_lea.hbm %s3018_s2, 512 }
  0x23   : > { %1661 = vmatpush.msra.mxu1 %v1517_v5  ;;  %1662 = vmatpush.msra.mxu2 %v1517_v5  ;;  %v2057_v16 = vld [vmem:[%s2039_s6 + $0x68] sm:$0xff]  ;;  %v2063_v18 = vld [vmem:[%s2039_s6 + $0x90] sm:$0xff]  ;;  %v2066_v19 = vld [vmem:[%s2039_s6 + $0x98] sm:$0xff]  ;;  %v292_v20 = vrot.slane %v2048_v13, 1  ;;  %v293_v21 = vrot.slane %v2051_v14, 1  ;;  %v302_v22 = vrot.slane %v2054_v15, 1 }
  0x24   : > { %1663 = vmatpush.msra.mxu3 %v1517_v5  ;;  %360 = vmatpush.msra.mxu0 %v1517_v5  ;;  %v303_v23 = vrot.slane %v2057_v16, 1  ;;  %v312_v25 = vrot.slane %v2063_v18, 1  ;;  %v313_v26 = vrot.slane %v2066_v19, 1  ;;  %v2081_v28 = vld [vmem:[%s2039_s6] sm:$0xff]  ;;  %v2084_v29 = vld [vmem:[%s2039_s6 + $0x8] sm:$0xff]  ;;  %v2164_v58 = vld [vmem:[%s2039_s6 + $0x78] sm:$0xff] }
  0x25   : > { %1664 = vmatpush.msra.mxu1 %v1516_v6  ;;  %1665 = vmatpush.msra.mxu2 %v1516_v6  ;;  %v2087_v30 = vsel %vm281_vm0, %v292_v20, %v293_v21  ;;  %v2096_v33 = vld [vmem:[%s2039_s6 + $0x70] sm:$0x3]  ;;  %v2105_v36 = vld [vmem:[%s2039_s6 + $0x40] sm:$0x3]  ;;  %v282_v37 = vrot.slane %v2081_v28, 1  ;;  %v283_v38 = vrot.slane %v2084_v29, 1 }
  0x26   : > { %1666 = vmatpush.msra.mxu3 %v1516_v6  ;;  %361 = vmatpush.msra.mxu0 %v1516_v6  ;;  %v2090_v31 = vsel %vm281_vm0, %v302_v22, %v303_v23  ;;  %v2102_v35 = vsel %vm281_vm0, %v312_v25, %v313_v26  ;;  %v305_v42 = vrot.slane %v2096_v33, 1  ;;  %v2122_v43 = vld [vmem:[%s2039_s6 + $0xa0] sm:$0x3]  ;;  %v295_v46 = vrot.slane %v2105_v36, 1  ;;  %v2177_v62 = vld [vmem:[%s2039_s6 + $0x48] sm:$0xff]  ;;  %v2180_v63 = vld [vmem:[%s2039_s6 + $0x50] sm:$0xff] }
  0x27   : > { %1667 = vmatpush.msra.mxu1 %v1515_v7  ;;  %1668 = vmatpush.msra.mxu2 %v1515_v7  ;;  %v284_v48 = vsel %vm281_vm0, %v282_v37, %v283_v38  ;;  %v315_v51 = vrot.slane %v2122_v43, 1  ;;  %v1551_v56 = vld [vmem:[%s3017_s1 + $0x1e0] sm:$0xff]  ;;  %v1550_v0 = vld [vmem:[%s3017_s1 + $0x1d8] sm:$0xff]  ;;  %v251_v2 = vld [vmem:[%s3017_s1 + $0x50] sm:$0xff]  ;;  %v307_v5 = vrot.slane %v2164_v58, 1  ;;  %s1362_s10 = sshll.u32 %s1359_s8, 4  ;;  %s1363_s10 = int_to_ptr.hbm [resolvable:$true] %s1362_s10 }
  0x28   : > { %1669 = vmatpush.msra.mxu3 %v1515_v7  ;;  %362 = vmatpush.msra.mxu0 %v1515_v7  ;;  %v2149_v53 = vsel %vm281_vm0, %v303_v23, %v305_v42  ;;  %v2152_v54 = vsel %vm281_vm0, %v293_v21, %v295_v46  ;;  %v2167_v59 = vld [vmem:[%s2039_s6 + $0x80] sm:$0xff]  ;;  %v1570_v1 = vld [vmem:[%s3017_s1 + $0x278] sm:$0xff]  ;;  %v1532_v3 = vld [vmem:[%s3017_s1 + $0x148] sm:$0xff] }
  0x29   : > { %1670 = vmatpush.msra.mxu1 %v1514_v8  ;;  %1671 = vmatpush.msra.mxu2 %v1514_v8  ;;  %v2171_v60 = vsel %vm281_vm0, %v313_v26, %v315_v51  ;;  %v1549_v4 = vld [vmem:[%s3017_s1 + $0x1d0] sm:$0xff]  ;;  %v308_v6 = vrot.slane %v2167_v59, 1  ;;  %v1531_v20 = vld [vmem:[%s3017_s1 + $0x140] sm:$0xff]  ;;  %v1548_v21 = vld [vmem:[%s3017_s1 + $0x1c8] sm:$0xff] }
  0x2a   : > { %1672 = vmatpush.msra.mxu3 %v1514_v8  ;;  %363 = vmatpush.msra.mxu0 %v1514_v8  ;;  %v2201_v7 = vld [vmem:[%s2039_s6 + $0x10] sm:$0x3]  ;;  %v1568_v22 = vld [vmem:[%s3017_s1 + $0x268] sm:$0xff]  ;;  %v1547_v37 = vld [vmem:[%s3017_s1 + $0x1c0] sm:$0xff] }
  0x2b   : > { %1673 = vmatpush.msra.mxu1 %v1513_v9  ;;  %1674 = vmatpush.msra.mxu2 %v1513_v9  ;;  %v1569_v8 = vld [vmem:[%s3017_s1 + $0x270] sm:$0xff]  ;;  %v285_v23 = vrot.slane %v2201_v7, 1  ;;  %v2234_v25 = vsel %vm281_vm0, %v307_v5, %v308_v6  ;;  %v2260_v42 = vld [vmem:[%s2039_s6 + $0x88] sm:$0x3]  ;;  %v2272_v46 = vld [vmem:[%s2039_s6 + $0x58] sm:$0x3] }
  0x2c   : > { %1675 = vmatpush.msra.mxu3 %v1513_v9  ;;  %364 = vmatpush.msra.mxu0 %v1513_v9  ;;  %v297_v9 = vrot.slane %v2177_v62, 1  ;;  %v2288_v51 = vld [vmem:[%s2039_s6 + $0x18] sm:$0xff] }
  0x2d   : > { %1676 = vmatpush.msra.mxu1 %v1512_v10  ;;  %1677 = vmatpush.msra.mxu2 %v1512_v10 }
  0x2e   : > { %1678 = vmatpush.msra.mxu3 %v1512_v10  ;;  %365 = vmatpush.msra.mxu0 %v1512_v10  ;;  %v298_v10 = vrot.slane %v2180_v63, 1 }
  0x2f   : > { %1679 = vmatpush.msra.mxu1 %v1511_v11  ;;  %1680 = vmatpush.msra.mxu2 %v1511_v11 }
  0x30   : > { %1681 = vmatpush.msra.mxu3 %v1511_v11  ;;  %366 = vmatpush.msra.mxu0 %v1511_v11  ;;  %v2210_v11 = vld [vmem:[%s2039_s6 + $0xa8] sm:$0xff] }
  0x31   : > { %1682 = vmatpush.msra.mxu1 %v1510_v12  ;;  %1683 = vmatpush.msra.mxu2 %v1510_v12  ;;  %v317_v26 = vrot.slane %v2210_v11, 1 }
  0x32   : > { %1684 = vmatpush.msra.mxu3 %v1510_v12  ;;  %367 = vmatpush.msra.mxu0 %v1510_v12  ;;  %v2213_v12 = vld [vmem:[%s2039_s6 + $0xb0] sm:$0xff] }
  0x33   : > { %1685 = vmatpush.msra.mxu1 %v1509_v17  ;;  %1686 = vmatpush.msra.mxu2 %v1509_v17 }
  0x34   : > { %1687 = vmatpush.msra.mxu3 %v1509_v17  ;;  %368 = vmatpush.msra.mxu0 %v1509_v17  ;;  %v250_v17 = vld [vmem:[%s3017_s1 + $0x48] sm:$0xff] }
  0x35   : > { %1688 = vmatpush.msra.mxu1 %v1508_v24  ;;  %1689 = vmatpush.msra.mxu2 %v1508_v24 }
  0x36   : > { %1690 = vmatpush.msra.mxu3 %v1508_v24  ;;  %369 = vmatpush.msra.mxu0 %v1508_v24  ;;  %v249_v24 = vld [vmem:[%s3017_s1 + $0x40] sm:$0xff] }
  0x37   : > { %1691 = vmatpush.msra.mxu1 %v1507_v27  ;;  %1692 = vmatpush.msra.mxu2 %v1507_v27 }
  0x38   : > { %383 = vmatmul.f32.vlgmr.msra.gmra.mxu1 %v2087_v30  ;;  %395 = vmatmul.f32.vlgmr.msra.gmra.mxu2 %v2090_v31 }
  0x39   : > { %559 = vmatpush.msrb.mxu2 %v1538_v32  ;;  %1693 = vmatpush.msra.mxu3 %v1507_v27  ;;  %v2241_v32 = vsel %vm281_vm0, %v297_v9, %v298_v10 }
  0x3a   : > { %420 = vmatpush.msrb.mxu1 %v256_v34  ;;  %407 = vmatmul.f32.vlgmr.msra.gmra.mxu3 %v2102_v35  ;;  %v1530_v34 = vld [vmem:[%s3017_s1 + $0x138] sm:$0xff] }
  0x3b   : > { %560 = vmatpush.msrb.mxu2 %v1537_v39  ;;  %657 = vmatpush.msrb.mxu3 %v1554_v40  ;;  %v1567_v39 = vld [vmem:[%s3017_s1 + $0x260] sm:$0xff]  ;;  %v248_v40 = vld [vmem:[%s3017_s1 + $0x38] sm:$0xff] }
  0x3c   : > { %421 = vmatpush.msrb.mxu1 %v255_v41  ;;  %370 = vmatpush.msra.mxu0 %v1507_v27  ;;  %v318_v27 = vrot.slane %v2213_v12, 1  ;;  %v286_v41 = vsel %vm281_vm0, %v283_v38, %v285_v23  ;;  %v1546_v38 = vld [vmem:[%s3017_s1 + $0x1b8] sm:$0xff] }
  0x3d   : > { %561 = vmatpush.msrb.mxu2 %v1536_v44  ;;  %658 = vmatpush.msrb.mxu3 %v1553_v45  ;;  %v1529_v45 = vld [vmem:[%s3017_s1 + $0x130] sm:$0xff] }
  0x3e   : > { %422 = vmatpush.msrb.mxu1 %v254_v47  ;;  %371 = vmatmul.f32.vlgmr.msra.gmra.mxu0 %v284_v48  ;;  %v2266_v44 = vsel %vm281_vm0, %v317_v26, %v318_v27  ;;  %v1566_v47 = vld [vmem:[%s3017_s1 + $0x258] sm:$0xff]  ;;  %v247_v48 = vld [vmem:[%s3017_s1 + $0x30] sm:$0xff] }
  0x3f   : > { %562 = vmatpush.msrb.mxu2 %v1535_v49  ;;  %659 = vmatpush.msrb.mxu3 %v1552_v50  ;;  %v1528_v49 = vld [vmem:[%s3017_s1 + $0x128] sm:$0xff]  ;;  %v310_v50 = vrot.slane %v2260_v42, 1  ;;  %v1525_v26 = vld [vmem:[%s3017_s1 + $0x110] sm:$0xff] }
  0x40   : > { %423 = vmatpush.msrb.mxu1 %v253_v52  ;;  %398 = vmatmul.f32.gmra.mxu2 %v2149_v53  ;;  %v2291_v52 = vld [vmem:[%s2039_s6 + $0x20] sm:$0xff] }
  0x41   : > { %386 = vmatmul.f32.gmra.mxu1 %v2152_v54  ;;  %563 = vmatpush.msrb.mxu2 %v1534_v55  ;;  %v1545_v55 = vld [vmem:[%s3017_s1 + $0x1b0] sm:$0xff]  ;;  %v288_v5 = vrot.slane %v2291_v52, 1  ;;  %v2324_v9 = vsel %vm281_vm0, %v308_v6, %v310_v50  ;;  %v1543_v6 = vld [vmem:[%s3017_s1 + $0x1a0] sm:$0xff]  ;;  %v1540_v50 = vld [vmem:[%s3017_s1 + $0x188] sm:$0xff] }
  0x42   : > { %660 = vmatpush.msrb.mxu3 %v1551_v56  ;;  %424 = vmatpush.msrb.mxu1 %v252_v57  ;;  %v1565_v56 = vld [vmem:[%s3017_s1 + $0x250] sm:$0xff]  ;;  %v300_v57 = vrot.slane %v2272_v46, 1 }
  0x43   : > { %410 = vmatmul.f32.gmra.mxu3 %v2171_v60  ;;  %564 = vmatpush.msrb.mxu2 %v1533_v61  ;;  %v2302_v61 = vld [vmem:[%s2039_s6 + $0xb8] sm:$0x3] }
  0x44   : > { %661 = vmatpush.msrb.mxu3 %v1550_v0  ;;  %765 = vmatpush.msrb.mxu0 %v1570_v1  ;;  %v246_v0 = vld [vmem:[%s3017_s1 + $0x28] sm:$0xff]  ;;  %v1527_v1 = vld [vmem:[%s3017_s1 + $0x120] sm:$0xff] }
  0x45   : > { %425 = vmatpush.msrb.mxu1 %v251_v2  ;;  %565 = vmatpush.msrb.mxu2 %v1532_v3  ;;  %v1544_v2 = vld [vmem:[%s3017_s1 + $0x1a8] sm:$0xff] }
  0x46   : > { %662 = vmatpush.msrb.mxu3 %v1549_v4  ;;  %766 = vmatpush.msrb.mxu0 %v1569_v8  ;;  %v1564_v3 = vld [vmem:[%s3017_s1 + $0x248] sm:$0xff]  ;;  %v287_v4 = vrot.slane %v2288_v51, 1  ;;  %v245_v8 = vld [vmem:[%s3017_s1 + $0x20] sm:$0xff] }
  0x47   : > { %426 = vmatpush.msrb.mxu1 %v250_v17  ;;  %566 = vmatpush.msrb.mxu2 %v1531_v20  ;;  %v320_v17 = vrot.slane %v2302_v61, 1  ;;  %v2330_v20 = vsel %vm281_vm0, %v298_v10, %v300_v57  ;;  %v244_v10 = vld [vmem:[%s3017_s1 + $0x18] sm:$0xff]  ;;  %v241_v57 = vld [vmem:[%s3017_s1] sm:$0xff] }
  0x48   : > { %663 = vmatpush.msrb.mxu3 %v1548_v21  ;;  %767 = vmatpush.msrb.mxu0 %v1568_v22  ;;  %v1526_v21 = vld [vmem:[%s3017_s1 + $0x118] sm:$0xff]  ;;  %v1563_v22 = vld [vmem:[%s3017_s1 + $0x240] sm:$0xff]  ;;  %v2346_v23 = vsel %vm281_vm0, %v287_v4, %v288_v5 }
  0x49   : > { %427 = vmatpush.msrb.mxu1 %v249_v24  ;;  %401 = vmatmul.f32.gmra.mxu2 %v2234_v25  ;;  %v2352_v24 = vsel %vm281_vm0, %v318_v27, %v320_v17  ;;  %v243_v27 = vld [vmem:[%s3017_s1 + $0x10] sm:$0xff]  ;;  %v1618_v17 = vld [vmem:[%s3017_s1 + $0x3f8] sm:$0xff] }
  0x4a   : > { %389 = vmatmul.f32.gmra.mxu1 %v2241_v32  ;;  %567 = vmatpush.msrb.mxu2 %v1530_v34  ;;  %v1542_v34 = vld [vmem:[%s3017_s1 + $0x198] sm:$0xff] }
  0x4b   : > { %664 = vmatpush.msrb.mxu3 %v1547_v37  ;;  %768 = vmatpush.msrb.mxu0 %v1567_v39  ;;  %v1562_v37 = vld [vmem:[%s3017_s1 + $0x238] sm:$0xff]  ;;  %v1524_v39 = vld [vmem:[%s3017_s1 + $0x108] sm:$0xff] }
  0x4c   : > { %428 = vmatpush.msrb.mxu1 %v248_v40  ;;  %374 = vmatmul.f32.gmra.mxu0 %v286_v41  ;;  %v486_v40 = vrot.slane %v2081_v28, 2  ;;  %v487_v41 = vrot.slane %v2084_v29, 2 }
  0x4d   : > { %413 = vmatmul.f32.gmra.mxu3 %v2266_v44  ;;  %568 = vmatpush.msrb.mxu2 %v1529_v45  ;;  %v2373_v45 = vld [vmem:[%s2039_s6 + $0x28] sm:$0x3] }
  0x4e   : > { %665 = vmatpush.msrb.mxu3 %v1546_v38  ;;  %769 = vmatpush.msrb.mxu0 %v1566_v47  ;;  %v1541_v38 = vld [vmem:[%s3017_s1 + $0x190] sm:$0xff] }
  0x4f   : > { %429 = vmatpush.msrb.mxu1 %v247_v48  ;;  %569 = vmatpush.msrb.mxu2 %v1528_v49  ;;  %v1561_v47 = vld [vmem:[%s3017_s1 + $0x230] sm:$0xff]  ;;  %v242_v48 = vld [vmem:[%s3017_s1 + $0x8] sm:$0xff]  ;;  %v1523_v49 = vld [vmem:[%s3017_s1 + $0x100] sm:$0xff] }
  0x50   : > { %666 = vmatpush.msrb.mxu3 %v1545_v55  ;;  %770 = vmatpush.msrb.mxu0 %v1565_v56  ;;  %v1560_v55 = vld [vmem:[%s3017_s1 + $0x228] sm:$0xff]  ;;  %v290_v56 = vrot.slane %v2373_v45, 1 }
  0x51   : > { %430 = vmatpush.msrb.mxu1 %v246_v0  ;;  %570 = vmatpush.msrb.mxu2 %v1527_v1  ;;  %v488_v0 = vsel %vm485_vm1, %v486_v40, %v487_v41  ;;  %v1539_v1 = vld [vmem:[%s3017_s1 + $0x180] sm:$0xff]  ;;  %v1634_v40 = vld [vmem:[%s3017_s1 + $0x478] sm:$0xff] }
  0x52   : > { %667 = vmatpush.msrb.mxu3 %v1544_v2  ;;  %771 = vmatpush.msrb.mxu0 %v1564_v3  ;;  %v1559_v2 = vld [vmem:[%s3017_s1 + $0x220] sm:$0xff]  ;;  %v1602_v3 = vld [vmem:[%s3017_s1 + $0x378] sm:$0xff]  ;;  %v2409_v4 = vsel %vm281_vm0, %v288_v5, %v290_v56 }
  0x53   : > { %431 = vmatpush.msrb.mxu1 %v245_v8  ;;  %404 = vmatmul.f32.gmra.mxu2 %v2324_v9  ;;  %v1558_v8 = vld [vmem:[%s3017_s1 + $0x218] sm:$0xff] }
  0x54   : > { %392 = vmatmul.f32.gmra.mxu1 %v2330_v20  ;;  %571 = vmatpush.msrb.mxu2 %v1526_v21  ;;  %v489_v21 = vrot.slane %v2201_v7, 2  ;;  %v1586_v5 = vld [vmem:[%s3017_s1 + $0x2f8] sm:$0xff]  ;;  %v1617_v7 = vld [vmem:[%s3017_s1 + $0x3f0] sm:$0xff] }
  0x55   : > { %668 = vmatpush.msrb.mxu3 %v1543_v6  ;;  %772 = vmatpush.msrb.mxu0 %v1563_v22  ;;  %v1557_v6 = vld [vmem:[%s3017_s1 + $0x210] sm:$0xff]  ;;  %v1582_v56 = vld [vmem:[%s3017_s1 + $0x2d8] sm:$0xff] }
  0x56   : > { %432 = vmatpush.msrb.mxu1 %v244_v10  ;;  %377 = vmatmul.f32.gmra.mxu0 %v2346_v23  ;;  %v1585_v22 = vld [vmem:[%s3017_s1 + $0x2f0] sm:$0xff]  ;;  %v1600_v10 = vld [vmem:[%s3017_s1 + $0x368] sm:$0xff] }
  0x57   : > { %416 = vmatmul.f32.gmra.mxu3 %v2352_v24  ;;  %572 = vmatpush.msrb.mxu2 %v1525_v26  ;;  %v1556_v26 = vld [vmem:[%s3017_s1 + $0x208] sm:$0xff] }
  0x58   : > { %669 = vmatpush.msrb.mxu3 %v1542_v34  ;;  %773 = vmatpush.msrb.mxu0 %v1562_v37  ;;  %v490_v34 = vsel %vm485_vm1, %v487_v41, %v489_v21  ;;  %v1616_v37 = vld [vmem:[%s3017_s1 + $0x3e8] sm:$0xff]  ;;  %v491_v41 = vrot.slane %v2288_v51, 2 }
  0x59   : > { %433 = vmatpush.msrb.mxu1 %v243_v27  ;;  %573 = vmatpush.msrb.mxu2 %v1524_v39  ;;  %v1555_v27 = vld [vmem:[%s3017_s1 + $0x200] sm:$0xff]  ;;  %v1584_v39 = vld [vmem:[%s3017_s1 + $0x2e8] sm:$0xff] }
  0x5a   : > { %670 = vmatpush.msrb.mxu3 %v1541_v38  ;;  %774 = vmatpush.msrb.mxu0 %v1561_v47  ;;  %v492_v38 = vrot.slane %v2291_v52, 2  ;;  %v1599_v47 = vld [vmem:[%s3017_s1 + $0x360] sm:$0xff]  ;;  %v1596_v21 = vld [vmem:[%s3017_s1 + $0x348] sm:$0xff] }
  0x5b   : > { %434 = vmatpush.msrb.mxu1 %v242_v48  ;;  %574 = vmatpush.msrb.mxu2 %v1523_v49  ;;  %v1615_v48 = vld [vmem:[%s3017_s1 + $0x3e0] sm:$0xff]  ;;  %v1633_v49 = vld [vmem:[%s3017_s1 + $0x470] sm:$0xff] }
  0x5c   : > { %671 = vmatpush.msrb.mxu3 %v1540_v50  ;;  %775 = vmatpush.msrb.mxu0 %v1560_v55  ;;  %v1598_v50 = vld [vmem:[%s3017_s1 + $0x358] sm:$0xff] }
  0x5d   : > { %435 = vmatpush.msrb.mxu1 %v241_v57  ;;  %575 = vmatmul.f32.vlgmr.msrb.gmra.mxu2 %v488_v0  ;;  %v1614_v55 = vld [vmem:[%s3017_s1 + $0x3d8] sm:$0xff]  ;;  %v1632_v57 = vld [vmem:[%s3017_s1 + $0x468] sm:$0xff]  ;;  %v1597_v0 = vld [vmem:[%s3017_s1 + $0x350] sm:$0xff] }
  0x5e   : > { %436 = vmatmul.f32.vlgmr.msrb.gmra.mxu1 %v2081_v28  ;;  %672 = vmatpush.msrb.mxu3 %v1539_v1  ;;  %v1601_v28 = vld [vmem:[%s3017_s1 + $0x370] sm:$0xff]  ;;  %v1631_v1 = vld [vmem:[%s3017_s1 + $0x460] sm:$0xff] }
  0x5f   : > { %776 = vmatpush.msrb.mxu0 %v1559_v2  ;;  %968 = vmatpush.msra.mxu2 %v1602_v3  ;;  %v1613_v2 = vld [vmem:[%s3017_s1 + $0x3d0] sm:$0xff]  ;;  %v494_v3 = vrot.slane %v2373_v45, 2 }
  0x60   : > { %380 = vmatmul.f32.gmra.mxu0 %v2409_v4  ;;  %673 = vmatmul.f32.vlgmr.msrb.gmra.mxu3 %v2288_v51  ;;  %v1629_v45 = vld [vmem:[%s3017_s1 + $0x450] sm:$0xff] }
  0x61   : > { %777 = vmatpush.msrb.mxu0 %v1558_v8  ;;  %1076 = vmatpush.msra.mxu3 %v1618_v17  ;;  %v1630_v8 = vld [vmem:[%s3017_s1 + $0x458] sm:$0xff]  ;;  %v1581_v17 = vld [vmem:[%s3017_s1 + $0x2d0] sm:$0xff] }
  0x62   : > { %870 = vmatpush.msra.mxu1 %v1586_v5  ;;  %969 = vmatpush.msra.mxu2 %v1601_v28  ;;  %v1580_v5 = vld [vmem:[%s3017_s1 + $0x2c8] sm:$0xff]  ;;  %v2520_v28 = vsel %vm485_vm1, %v492_v38, %v494_v3  ;;  %v507_v3 = vrot.slane %v2057_v16, 2 }
  0x63   : > { %778 = vmatpush.msrb.mxu0 %v1557_v6  ;;  %1077 = vmatpush.msra.mxu3 %v1617_v7  ;;  %v497_v6 = vrot.slane %v2051_v14, 2  ;;  %v1595_v7 = vld [vmem:[%s3017_s1 + $0x340] sm:$0xff] }
  0x64   : > { %871 = vmatpush.msra.mxu1 %v1585_v22  ;;  %970 = vmatpush.msra.mxu2 %v1600_v10  ;;  %v1611_v22 = vld [vmem:[%s3017_s1 + $0x3c0] sm:$0xff] }
  0x65   : > { %779 = vmatpush.msrb.mxu0 %v1556_v26  ;;  %578 = vmatmul.f32.gmra.mxu2 %v490_v34  ;;  %v1579_v10 = vld [vmem:[%s3017_s1 + $0x2c0] sm:$0xff]  ;;  %v499_v34 = vrot.slane %v2105_v36, 2  ;;  %v1578_v36 = vld [vmem:[%s3017_s1 + $0x2b8] sm:$0xff] }
  0x66   : > { %439 = vmatmul.f32.gmra.mxu1 %v2084_v29  ;;  %1078 = vmatpush.msra.mxu3 %v1616_v37  ;;  %v1583_v29 = vld [vmem:[%s3017_s1 + $0x2e0] sm:$0xff]  ;;  %v1594_v37 = vld [vmem:[%s3017_s1 + $0x338] sm:$0xff] }
  0x67   : > { %780 = vmatpush.msrb.mxu0 %v1555_v27  ;;  %872 = vmatpush.msra.mxu1 %v1584_v39  ;;  %v1610_v27 = vld [vmem:[%s3017_s1 + $0x3b8] sm:$0xff]  ;;  %v1627_v39 = vld [vmem:[%s3017_s1 + $0x440] sm:$0xff] }
  0x68   : > { %676 = vmatmul.f32.gmra.mxu3 %v2291_v52  ;;  %781 = vmatmul.f32.vlgmr.msrb.gmra.mxu0 %v2346_v23  ;;  %v2482_v23 = vsel %vm485_vm1, %v491_v41, %v492_v38  ;;  %v501_v41 = vrot.slane %v2177_v62, 2  ;;  %v502_v38 = vrot.slane %v2180_v63, 2 }
  0x69   : > { %1181 = vmatpush.msra.mxu0 %v1634_v40  ;;  %971 = vmatpush.msra.mxu2 %v1599_v47  ;;  %v2561_v40 = vsel %vm485_vm1, %v497_v6, %v499_v34  ;;  %v1593_v47 = vld [vmem:[%s3017_s1 + $0x330] sm:$0xff] }
  0x6a   : > { %1079 = vmatpush.msra.mxu3 %v1615_v48  ;;  %873 = vmatpush.msra.mxu1 %v1583_v29  ;;  %v1609_v48 = vld [vmem:[%s3017_s1 + $0x3b0] sm:$0xff]  ;;  %v1626_v29 = vld [vmem:[%s3017_s1 + $0x438] sm:$0xff] }
  0x6b   : > { %1182 = vmatpush.msra.mxu0 %v1633_v49  ;;  %972 = vmatpush.msra.mxu2 %v1598_v50  ;;  %v1577_v49 = vld [vmem:[%s3017_s1 + $0x2b0] sm:$0xff]  ;;  %v2582_v50 = vsel %vm485_vm1, %v501_v41, %v502_v38  ;;  %v1604_v41 = vld [vmem:[%s3017_s1 + $0x388] sm:$0xff] }
  0x6c   : > { %1080 = vmatpush.msra.mxu3 %v1614_v55  ;;  %874 = vmatpush.msra.mxu1 %v1582_v56  ;;  %v504_v55 = vrot.slane %v2272_v46, 2  ;;  %v1592_v56 = vld [vmem:[%s3017_s1 + $0x328] sm:$0xff]  ;;  %v1605_v34 = vld [vmem:[%s3017_s1 + $0x390] sm:$0xff] }
  0x6d   : > { %581 = vmatmul.f32.gmra.mxu2 %v2482_v23  ;;  %1183 = vmatpush.msra.mxu0 %v1632_v57  ;;  %v1608_v57 = vld [vmem:[%s3017_s1 + $0x3a8] sm:$0xff] }
  0x6e   : > { %442 = vmatmul.f32.gmra.mxu1 %v2288_v51  ;;  %973 = vmatpush.msra.mxu2 %v1597_v0  ;;  %v1612_v51 = vld [vmem:[%s3017_s1 + $0x3c8] sm:$0xff]  ;;  %v1625_v0 = vld [vmem:[%s3017_s1 + $0x430] sm:$0xff] }
  0x6f   : > { %1184 = vmatpush.msra.mxu0 %v1631_v1  ;;  %1081 = vmatpush.msra.mxu3 %v1613_v2  ;;  %v1576_v46 = vld [vmem:[%s3017_s1 + $0x2a8] sm:$0xff]  ;;  %v2602_v1 = vsel %vm485_vm1, %v502_v38, %v504_v55  ;;  %v506_v2 = vrot.slane %v2054_v15, 2  ;;  %v1621_v38 = vld [vmem:[%s3017_s1 + $0x410] sm:$0xff]  ;;  %v1587_v55 = vld [vmem:[%s3017_s1 + $0x300] sm:$0xff] }
  0x70   : > { %679 = vmatmul.f32.gmra.mxu3 %v2048_v13  ;;  %784 = vmatmul.f32.gmra.mxu0 %v2409_v4  ;;  %v496_v4 = vrot.slane %v2048_v13, 2 }
  0x71   : > { %1185 = vmatpush.msra.mxu0 %v1630_v8  ;;  %875 = vmatpush.msra.mxu1 %v1581_v17  ;;  %v1591_v8 = vld [vmem:[%s3017_s1 + $0x320] sm:$0xff] }
  0x72   : > { %974 = vmatpush.msra.mxu2 %v1596_v21  ;;  %1082 = vmatpush.msra.mxu3 %v1612_v51  ;;  %v2541_v26 = vsel %vm485_vm1, %v496_v4, %v497_v6  ;;  %v1607_v17 = vld [vmem:[%s3017_s1 + $0x3a0] sm:$0xff]  ;;  %v1624_v21 = vld [vmem:[%s3017_s1 + $0x428] sm:$0xff]  ;;  %v1590_v4 = vld [vmem:[%s3017_s1 + $0x318] sm:$0xff] }
  0x73   : > { %1186 = vmatpush.msra.mxu0 %v1629_v45  ;;  %876 = vmatpush.msra.mxu1 %v1580_v5  ;;  %v1575_v51 = vld [vmem:[%s3017_s1 + $0x2a0] sm:$0xff]  ;;  %v2623_v45 = vsel %vm485_vm1, %v506_v2, %v507_v3  ;;  %v509_v5 = vrot.slane %v2096_v33, 2  ;;  %v1606_v6 = vld [vmem:[%s3017_s1 + $0x398] sm:$0xff] }
  0x74   : > { %975 = vmatpush.msra.mxu2 %v1595_v7  ;;  %1083 = vmatpush.msra.mxu3 %v1611_v22  ;;  %v1623_v7 = vld [vmem:[%s3017_s1 + $0x420] sm:$0xff]  ;;  %v511_v22 = vrot.slane %v2164_v58, 2 }
  0x75   : > { %584 = vmatmul.f32.gmra.mxu2 %v2520_v28  ;;  %877 = vmatpush.msra.mxu1 %v1579_v10  ;;  %v2643_v33 = vsel %vm485_vm1, %v507_v3, %v509_v5  ;;  %v1589_v10 = vld [vmem:[%s3017_s1 + $0x310] sm:$0xff] }
  0x76   : > { %445 = vmatmul.f32.gmra.mxu1 %v2291_v52  ;;  %v1628_v52 = vld [vmem:[%s3017_s1 + $0x448] sm:$0xff]  ;;  %976 = vmatpush.msra.mxu2 %v1594_v37  ;;  %v1573_v37 = vld [vmem:[%s3017_s1 + $0x290] sm:$0xff] }
  0x77   : > { %1187 = vmatpush.msra.mxu0 %v1628_v52  ;;  %1084 = vmatpush.msra.mxu3 %v1610_v27  ;;  %v512_v52 = vrot.slane %v2167_v59, 2 }
  0x78   : > { %682 = vmatmul.f32.gmra.mxu3 %v2051_v14  ;;  %787 = vmatmul.f32.gmra.mxu0 %v2087_v30 }
  0x79   : > { %1188 = vmatpush.msra.mxu0 %v1627_v39  ;;  %878 = vmatpush.msra.mxu1 %v1578_v36  ;;  %v2664_v27 = vsel %vm485_vm1, %v511_v22, %v512_v52  ;;  %v514_v39 = vrot.slane %v2260_v42, 2  ;;  %v1588_v36 = vld [vmem:[%s3017_s1 + $0x308] sm:$0xff] }
  0x7a   : > { %977 = vmatpush.msra.mxu2 %v1593_v47  ;;  %1085 = vmatpush.msra.mxu3 %v1609_v48  ;;  %v1572_v42 = vld [vmem:[%s3017_s1 + $0x288] sm:$0xff] }
  0x7b   : > { %1189 = vmatpush.msra.mxu0 %v1626_v29  ;;  %879 = vmatpush.msra.mxu1 %v1577_v49  ;;  %v2684_v47 = vsel %vm485_vm1, %v512_v52, %v514_v39  ;;  %v516_v29 = vrot.slane %v2063_v18, 2  ;;  %v517_v49 = vrot.slane %v2066_v19, 2 }
  0x7c   : > { %978 = vmatpush.msra.mxu2 %v1592_v56  ;;  %1086 = vmatpush.msra.mxu3 %v1608_v57  ;;  %v1603_v56 = vld [vmem:[%s3017_s1 + $0x380] sm:$0xff]  ;;  %v1620_v57 = vld [vmem:[%s3017_s1 + $0x408] sm:$0xff] }
  0x7d   : > { %587 = vmatmul.f32.gmra.mxu2 %v2541_v26  ;;  %1190 = vmatpush.msra.mxu0 %v1625_v0  ;;  %v1571_v0 = vld [vmem:[%s3017_s1 + $0x280] sm:$0xff] }
  0x7e   : > { %448 = vmatmul.f32.gmra.mxu1 %v2048_v13  ;;  %979 = vmatpush.msra.mxu2 %v1591_v8 }
  0x7f   : > { %880 = vmatpush.msra.mxu1 %v1576_v46  ;;  %1087 = vmatpush.msra.mxu3 %v1607_v17  ;;  %v2707_v46 = vsel %vm485_vm1, %v516_v29, %v517_v49  ;;  %v519_v17 = vrot.slane %v2122_v43, 2  ;;  %v521_v43 = vrot.slane %v2210_v11, 2  ;;  %v2771_v29 = vld [vmem:[%s2039_s6 + $0xd0] sm:$0x3] }
  0x80   : > { %685 = vmatmul.f32.gmra.mxu3 %v2177_v62  ;;  %790 = vmatmul.f32.gmra.mxu0 %v2152_v54 }
  0x81   : > { %1191 = vmatpush.msra.mxu0 %v1624_v21  ;;  %881 = vmatpush.msra.mxu1 %v1575_v51  ;;  %v1619_v51 = vld [vmem:[%s3017_s1 + $0x400] sm:$0xff]  ;;  %v2724_v5 = vsel %vm485_vm1, %v517_v49, %v519_v17  ;;  %v744_v49 = vrot.slane %v2771_v29, 1 }
  0x82   : > { %980 = vmatpush.msra.mxu2 %v1590_v4  ;;  %1088 = vmatpush.msra.mxu3 %v1606_v6  ;;  %v522_v6 = vrot.slane %v2213_v12, 2 }
  0x83   : > { %1192 = vmatpush.msra.mxu0 %v1623_v7 }
  0x84   : > { %981 = vmatpush.msra.mxu2 %v1589_v10  ;;  %1089 = vmatpush.msra.mxu3 %v1605_v34  ;;  %v2739_v22 = vsel %vm485_vm1, %v521_v43, %v522_v6  ;;  %v524_v10 = vrot.slane %v2302_v61, 2  ;;  %v2750_v34 = vld [vmem:[%s2039_s6 + $0xc8] sm:$0xff] }
  0x85   : > { %590 = vmatmul.f32.gmra.mxu2 %v2561_v40 }
  0x86   : > { %451 = vmatmul.f32.gmra.mxu1 %v2051_v14  ;;  %982 = vmatpush.msra.mxu2 %v1588_v36  ;;  %v742_v36 = vrot.slane %v2750_v34, 1 }
  0x87   : > { %1090 = vmatpush.msra.mxu3 %v1604_v41  ;;  %v2761_v41 = vsel %vm485_vm1, %v522_v6, %v524_v10 }
  0x88   : > { %688 = vmatmul.f32.gmra.mxu3 %v2180_v63  ;;  %793 = vmatmul.f32.gmra.mxu0 %v2241_v32 }
  0x89   : > { %983 = vmatpush.msra.mxu2 %v1587_v55  ;;  %1091 = vmatpush.msra.mxu3 %v1603_v56 }
  0x8d   : > { %593 = vmatmul.f32.gmra.mxu2 %v2582_v50 }
  0x8e   : > { %454 = vmatmul.f32.gmra.mxu1 %v2177_v62 }
  0x90   : > { %691 = vmatmul.f32.gmra.mxu3 %v2054_v15  ;;  %796 = vmatmul.f32.gmra.mxu0 %v2330_v20 }
  0x95   : > { %596 = vmatmul.f32.gmra.mxu2 %v2602_v1 }
  0x96   : > { %457 = vmatmul.f32.gmra.mxu1 %v2180_v63 }
  0x98   : > { %694 = vmatmul.f32.gmra.mxu3 %v2057_v16  ;;  %799 = vmatmul.f32.gmra.mxu0 %v2090_v31 }
  0x9d   : > { %599 = vmatmul.f32.gmra.mxu2 %v2623_v45 }
  0x9e   : > { %460 = vmatmul.f32.gmra.mxu1 %v2054_v15  ;;  %v1574_v15 = vld [vmem:[%s3017_s1 + $0x298] sm:$0xff] }
  0x9f   : > { %882 = vmatpush.msra.mxu1 %v1574_v15 }
  0xa0   : > { %697 = vmatmul.f32.gmra.mxu3 %v2164_v58  ;;  %802 = vmatmul.f32.gmra.mxu0 %v2149_v53 }
  0xa1   : > { %883 = vmatpush.msra.mxu1 %v1573_v37 }
  0xa3   : > { %884 = vmatpush.msra.mxu1 %v1572_v42 }
  0xa5   : > { %602 = vmatmul.f32.gmra.mxu2 %v2643_v33  ;;  %885 = vmatpush.msra.mxu1 %v1571_v0  ;;  %v2780_v0 = vsel %vm281_vm0, %v742_v36, %v744_v49 }
  0xa6   : > { %463 = vmatmul.f32.gmra.mxu1 %v2057_v16  ;;  %v1622_v16 = vld [vmem:[%s3017_s1 + $0x418] sm:$0xff] }
  0xa7   : > { %1193 = vmatpush.msra.mxu0 %v1622_v16 }
  0xa8   : > { %700 = vmatmul.f32.gmra.mxu3 %v2167_v59  ;;  %805 = vmatmul.f32.gmra.mxu0 %v2234_v25 }
  0xa9   : > { %1194 = vmatpush.msra.mxu0 %v1621_v38 }
  0xab   : > { %1195 = vmatpush.msra.mxu0 %v1620_v57 }
  0xad   : > { %605 = vmatmul.f32.gmra.mxu2 %v2664_v27  ;;  %1196 = vmatpush.msra.mxu0 %v1619_v51 }
  0xae   : > { %466 = vmatmul.f32.gmra.mxu1 %v2164_v58 }
  0xb0   : > { %703 = vmatmul.f32.gmra.mxu3 %v2063_v18  ;;  %808 = vmatmul.f32.gmra.mxu0 %v2324_v9 }
  0xb5   : > { %608 = vmatmul.f32.gmra.mxu2 %v2684_v47  ;;  %v2687_v48 = vpop.f32.mrf.mxu1 }
  0xb6   : > { %469 = vmatmul.f32.gmra.mxu1 %v2167_v59 }
  0xb8   : > { %706 = vmatmul.f32.gmra.mxu3 %v2066_v19  ;;  %811 = vmatmul.f32.gmra.mxu0 %v2102_v35 }
  0xbb   : > { %v2709_v2 = vpop.f32.mrf.mxu2  ;;  %v372_v21 = vpop.f32.mrf.mxu0 }
  0xbd   : > { %611 = vmatmul.f32.gmra.mxu2 %v2707_v46  ;;  %v2712_v3 = vpop.f32.mrf.mxu3 }
  0xbe   : > { %472 = vmatmul.f32.gmra.mxu1 %v2063_v18  ;;  %v2715_v8 = vpop.f32.mrf.mxu1 }
  0xc0   : > { %709 = vmatmul.f32.gmra.mxu3 %v2210_v11  ;;  %814 = vmatmul.f32.gmra.mxu0 %v2171_v60 }
  0xc3   : > { %v2726_v4 = vpop.f32.mrf.mxu2 }
  0xc5   : > { %614 = vmatmul.f32.gmra.mxu2 %v2724_v5 }
  0xc6   : > { %475 = vmatmul.f32.gmra.mxu1 %v2066_v19  ;;  %v2730_v18 = vpop.f32.mrf.mxu3  ;;  %v2745_v19 = vld [vmem:[%s2039_s6 + $0xc0] sm:$0xff] }
  0xc7   : > { %v2734_v7 = vpop.f32.mrf.mxu1  ;;  %v741_v39 = vrot.slane %v2745_v19, 1 }
  0xc8   : > { %712 = vmatmul.f32.gmra.mxu3 %v2213_v12  ;;  %817 = vmatmul.f32.gmra.mxu0 %v2266_v44 }
  0xc9   : > { %v375_v15 = vpop.f32.mrf.mxu0  ;;  %v2765_v61 = vsel %vm281_vm0, %v741_v39, %v742_v36 }
  0xcc   : > { %v2741_v52 = vpop.f32.mrf.mxu2 }
  0xcd   : > { %617 = vmatmul.f32.gmra.mxu2 %v2739_v22 }
  0xce   : > { %478 = vmatmul.f32.gmra.mxu1 %v2210_v11 }
  0xd0   : > { %715 = vmatmul.f32.gmra.mxu3 %v2745_v19  ;;  %820 = vmatmul.f32.gmra.mxu0 %v2352_v24  ;;  %v2754_v16 = vpop.f32.mrf.mxu3 }
  0xd1   : > { %v2756_v37 = vpop.f32.mrf.mxu1 }
  0xd3   : > { %v378_v38 = vpop.f32.mrf.mxu0 }
  0xd5   : > { %620 = vmatmul.f32.gmra.mxu2 %v2761_v41 }
  0xd6   : > { %481 = vmatmul.f32.gmra.mxu1 %v2213_v12  ;;  %v2768_v42 = vpop.f32.mrf.mxu2 }
  0xd8   : > { %718 = vmatmul.f32.gmra.mxu3 %v2750_v34  ;;  %823 = vmatmul.f32.gmra.mxu0 %v2765_v61 }
  0xda   : > { %v2776_v55 = vpop.f32.mrf.mxu3 }
  0xdb   : > { %3022 = vst [vmem:[#allocation8_spill] sm:$0xff] %v2776_v55  ;;  %v437_v56 = vpop.f32.mrf.mxu1 }
  0xdc   : > { %v438_v17 = vadd.f32 %v437_v56, %v372_v21 }
  0xdd   : > { %v381_v57 = vpop.f32.mrf.mxu0  ;;  %984 = vmatmul.f32.vlgmr.msra.gmra.mxu2 %v2048_v13 }
  0xde   : > { %886 = vmatmul.f32.vlgmr.msra.gmra.mxu1 %v2482_v23 }
  0xe0   : > { %826 = vmatmul.f32.gmra.mxu0 %v2780_v0  ;;  %1092 = vmatmul.f32.vlgmr.msra.gmra.mxu3 %v2087_v30  ;;  %v576_v51 = vpop.f32.mrf.mxu2 }
  0xe1   : > { %v624_v43 = vadd.f32 %v576_v51, %v438_v17 }
  0xe3   : > { %v440_v6 = vpop.f32.mrf.mxu1  ;;  %v674_v10 = vpop.f32.mrf.mxu3 }
  0xe4   : > { %v2785_v39 = vadd.f32 %v674_v10, %v624_v43  ;;  %v441_v13 = vadd.f32 %v440_v6, %v375_v15 }
  0xe5   : > { %v2787_v55 = vpop.f32.mrf.mxu0  ;;  %987 = vmatmul.f32.gmra.mxu2 %v2051_v14 }
  0xe6   : > { %889 = vmatmul.f32.gmra.mxu1 %v2520_v28 }
  0xe8   : > { %1095 = vmatmul.f32.gmra.mxu3 %v2152_v54  ;;  %1197 = vmatmul.f32.vlgmr.msra.gmra.mxu0 %v2541_v26  ;;  %v579_v23 = vpop.f32.mrf.mxu2 }
  0xe9   : > { %v625_v21 = vadd.f32 %v579_v23, %v441_v13  ;;  %v1774_v23 = vld [vmem:[%s2039_s6 + $0x60] sm:$0xff] }
  0xeb   : > { %v443_v30 = vpop.f32.mrf.mxu1  ;;  %v677_v36 = vpop.f32.mrf.mxu3 }
  0xec   : > { %v2793_v49 = vadd.f32 %v677_v36, %v625_v21  ;;  %v444_v14 = vadd.f32 %v443_v30, %v378_v38 }
  0xed   : > { %v2795_v56 = vpop.f32.mrf.mxu0  ;;  %990 = vmatmul.f32.gmra.mxu2 %v2177_v62 }
  0xee   : > { %892 = vmatmul.f32.gmra.mxu1 %v2541_v26 }
  0xf0   : > { %1098 = vmatmul.f32.gmra.mxu3 %v2241_v32  ;;  %1200 = vmatmul.f32.gmra.mxu0 %v2561_v40  ;;  %v582_v54 = vpop.f32.mrf.mxu2 }
  0xf1   : > { %v626_v28 = vadd.f32 %v582_v54, %v444_v14  ;;  %v1775_v14 = vld [vmem:[%s2039_s6 + $0x68] sm:$0xff] }
  0xf3   : > { %v446_v15 = vpop.f32.mrf.mxu1  ;;  %v680_v17 = vpop.f32.mrf.mxu3 }
  0xf4   : > { %v2801_v51 = vadd.f32 %v680_v17, %v626_v28  ;;  %v447_v62 = vadd.f32 %v446_v15, %v381_v57 }
  0xf5   : > { %v2803_v43 = vpop.f32.mrf.mxu0  ;;  %993 = vmatmul.f32.gmra.mxu2 %v2180_v63 }
  0xf6   : > { %895 = vmatmul.f32.gmra.mxu1 %v2561_v40 }
  0xf8   : > { %1101 = vmatmul.f32.gmra.mxu3 %v2330_v20  ;;  %1203 = vmatmul.f32.gmra.mxu0 %v2582_v50  ;;  %v585_v32 = vpop.f32.mrf.mxu2 }
  0xf9   : > { %v627_v26 = vadd.f32 %v585_v32, %v447_v62 }
  0xfb   : > { %v449_v38 = vpop.f32.mrf.mxu1  ;;  %v683_v6 = vpop.f32.mrf.mxu3 }
  0xfc   : > { %v2809_v10 = vadd.f32 %v683_v6, %v627_v26  ;;  %v450_v63 = vadd.f32 %v449_v38, %v2687_v48 }
  0xfd   : > { %v2811_v13 = vpop.f32.mrf.mxu0  ;;  %996 = vmatmul.f32.gmra.mxu2 %v1774_v23 }
  0xfe   : > { %898 = vmatmul.f32.gmra.mxu1 %v2582_v50 }
 0x100   : > { %1104 = vmatmul.f32.gmra.mxu3 %v2090_v31  ;;  %1206 = vmatmul.f32.gmra.mxu0 %v2602_v1  ;;  %v588_v20 = vpop.f32.mrf.mxu2 }
 0x101   : > { %v628_v40 = vadd.f32 %v588_v20, %v450_v63  ;;  %v1776_v20 = vld [vmem:[%s2039_s6 + $0x90] sm:$0xff] }
 0x103   : > { %v452_v57 = vpop.f32.mrf.mxu1  ;;  %v686_v21 = vpop.f32.mrf.mxu3 }
 0x104   : > { %v2818_v30 = vadd.f32 %v686_v21, %v628_v40  ;;  %v453_v50 = vadd.f32 %v452_v57, %v2715_v8 }
 0x105   : > { %v2820_v36 = vpop.f32.mrf.mxu0  ;;  %999 = vmatmul.f32.gmra.mxu2 %v1775_v14  ;;  %v1777_v14 = vld [vmem:[%s2039_s6 + $0x98] sm:$0xff] }
 0x106   : > { %901 = vmatmul.f32.gmra.mxu1 %v2602_v1 }
 0x108   : > { %1107 = vmatmul.f32.gmra.mxu3 %v2149_v53  ;;  %1209 = vmatmul.f32.gmra.mxu0 %v2623_v45  ;;  %v591_v31 = vpop.f32.mrf.mxu2 }
 0x109   : > { %v629_v48 = vadd.f32 %v591_v31, %v453_v50 }
 0x10b   : > { %v455_v54 = vpop.f32.mrf.mxu1  ;;  %v689_v28 = vpop.f32.mrf.mxu3 }
 0x10c   : > { %v2827_v15 = vadd.f32 %v689_v28, %v629_v48  ;;  %v456_v1 = vadd.f32 %v455_v54, %v2734_v7 }
 0x10d   : > { %v2829_v17 = vpop.f32.mrf.mxu0  ;;  %1002 = vmatmul.f32.gmra.mxu2 %v2164_v58 }
 0x10e   : > { %904 = vmatmul.f32.gmra.mxu1 %v2623_v45 }
 0x110   : > { %1110 = vmatmul.f32.gmra.mxu3 %v2234_v25  ;;  %1212 = vmatmul.f32.gmra.mxu0 %v2643_v33  ;;  %v594_v53 = vpop.f32.mrf.mxu2 }
 0x111   : > { %v630_v8 = vadd.f32 %v594_v53, %v456_v1 }
 0x113   : > { %v458_v62 = vpop.f32.mrf.mxu1  ;;  %v692_v32 = vpop.f32.mrf.mxu3 }
 0x114   : > { %v2836_v26 = vadd.f32 %v692_v32, %v630_v8  ;;  %v459_v58 = vadd.f32 %v458_v62, %v2756_v37 }
 0x115   : > { %v2838_v38 = vpop.f32.mrf.mxu0  ;;  %1005 = vmatmul.f32.gmra.mxu2 %v2167_v59 }
 0x116   : > { %907 = vmatmul.f32.gmra.mxu1 %v2643_v33 }
 0x118   : > { %1113 = vmatmul.f32.gmra.mxu3 %v2324_v9  ;;  %1215 = vmatmul.f32.gmra.mxu0 %v2664_v27  ;;  %v597_v25 = vpop.f32.mrf.mxu2 }
 0x119   : > { %v631_v45 = vadd.f32 %v597_v25, %v459_v58 }
 0x11b   : > { %v461_v7 = vpop.f32.mrf.mxu1  ;;  %v695_v6 = vpop.f32.mrf.mxu3 }
 0x11c   : > { %v2845_v23 = vadd.f32 %v695_v6, %v631_v45  ;;  %v462_v59 = vadd.f32 %v461_v7, %v2709_v2 }
 0x11d   : > { %v2847_v63 = vpop.f32.mrf.mxu0  ;;  %1008 = vmatmul.f32.gmra.mxu2 %v1776_v20  ;;  %v847_v20 = vrot.slane %v2750_v34, 2 }
 0x11e   : > { %910 = vmatmul.f32.gmra.mxu1 %v2664_v27 }
 0x120   : > { %1116 = vmatmul.f32.gmra.mxu3 %v2102_v35  ;;  %1218 = vmatmul.f32.gmra.mxu0 %v2684_v47  ;;  %v600_v9 = vpop.f32.mrf.mxu2 }
 0x121   : > { %v632_v33 = vadd.f32 %v600_v9, %v462_v59 }
 0x123   : > { %v464_v37 = vpop.f32.mrf.mxu1  ;;  %v698_v40 = vpop.f32.mrf.mxu3 }
 0x124   : > { %v730_v57 = vadd.f32 %v698_v40, %v632_v33  ;;  %v465_v27 = vadd.f32 %v464_v37, %v2726_v4  ;;  %v239_v40 = vld [vmem:[%s2039_s6 + $0xe0] sm:$0xff] }
 0x125   : > { %v806_v21 = vpop.f32.mrf.mxu0  ;;  %1011 = vmatmul.f32.gmra.mxu2 %v1777_v14 }
 0x126   : > { %v2855_v50 = vadd.f32 %v806_v21, %v730_v57  ;;  %913 = vmatmul.f32.gmra.mxu1 %v2684_v47 }
 0x128   : > { %1119 = vmatmul.f32.gmra.mxu3 %v2171_v60  ;;  %1221 = vmatmul.f32.gmra.mxu0 %v2707_v46  ;;  %v603_v35 = vpop.f32.mrf.mxu2 }
 0x129   : > { %v633_v2 = vadd.f32 %v603_v35, %v465_v27  ;;  %v1053_v27 = vrot.slane %v239_v40, 1 }
 0x12b   : > { %v467_v31 = vpop.f32.mrf.mxu1  ;;  %v701_v48 = vpop.f32.mrf.mxu3 }
 0x12c   : > { %v731_v54 = vadd.f32 %v701_v48, %v633_v2  ;;  %v468_v47 = vadd.f32 %v467_v31, %v2741_v52 }
 0x12d   : > { %v809_v28 = vpop.f32.mrf.mxu0  ;;  %1014 = vmatmul.f32.gmra.mxu2 %v2210_v11 }
 0x12e   : > { %v2862_v1 = vadd.f32 %v809_v28, %v731_v54  ;;  %916 = vmatmul.f32.gmra.mxu1 %v2707_v46 }
 0x130   : > { %1122 = vmatmul.f32.gmra.mxu3 %v2266_v44  ;;  %1224 = vmatmul.f32.gmra.mxu0 %v2724_v5  ;;  %v606_v60 = vpop.f32.mrf.mxu2 }
 0x131   : > { %v634_v4 = vadd.f32 %v606_v60, %v468_v47 }
 0x133   : > { %v470_v53 = vpop.f32.mrf.mxu1  ;;  %v704_v8 = vpop.f32.mrf.mxu3 }
 0x134   : > { %v732_v62 = vadd.f32 %v704_v8, %v634_v4  ;;  %v471_v11 = vadd.f32 %v470_v53, %v2768_v42  ;;  %v846_v42 = vrot.slane %v2745_v19, 2  ;;  %v1158_v53 = vrot.slane %v239_v40, 2 }
 0x135   : > { %v812_v32 = vpop.f32.mrf.mxu0  ;;  %1017 = vmatmul.f32.gmra.mxu2 %v2213_v12 }
 0x136   : > { %v2869_v58 = vadd.f32 %v812_v32, %v732_v62  ;;  %919 = vmatmul.f32.gmra.mxu1 %v2724_v5 }
 0x138   : > { %1125 = vmatmul.f32.gmra.mxu3 %v2352_v24  ;;  %1227 = vmatmul.f32.gmra.mxu0 %v2739_v22  ;;  %v609_v44 = vpop.f32.mrf.mxu2 }
 0x139   : > { %v635_v46 = vadd.f32 %v609_v44, %v471_v11 }
 0x13b   : > { %v473_v52 = vpop.f32.mrf.mxu1  ;;  %v707_v25 = vpop.f32.mrf.mxu3 }
 0x13c   : > { %v733_v45 = vadd.f32 %v707_v25, %v635_v46  ;;  %v474_v12 = vadd.f32 %v473_v52, %v2712_v3 }
 0x13d   : > { %v815_v7 = vpop.f32.mrf.mxu0  ;;  %1020 = vmatmul.f32.gmra.mxu2 %v2745_v19 }
 0x13e   : > { %v2876_v6 = vadd.f32 %v815_v7, %v733_v45  ;;  %922 = vmatmul.f32.gmra.mxu1 %v2739_v22  ;;  %v848_v22 = vsel %vm485_vm1, %v846_v42, %v847_v20 }
 0x140   : > { %1128 = vmatmul.f32.gmra.mxu3 %v2765_v61  ;;  %1230 = vmatmul.f32.gmra.mxu0 %v2761_v41  ;;  %v612_v24 = vpop.f32.mrf.mxu2  ;;  %v238_v61 = vld [vmem:[%s2039_s6 + $0xd8] sm:$0xff] }
 0x141   : > { %v636_v5 = vadd.f32 %v612_v24, %v474_v12  ;;  %v1052_v14 = vrot.slane %v238_v61, 1  ;;  %v1157_v60 = vrot.slane %v238_v61, 2 }
 0x143   : > { %v476_v59 = vpop.f32.mrf.mxu1  ;;  %v710_v9 = vpop.f32.mrf.mxu3  ;;  %v1159_v46 = vsel %vm485_vm1, %v1157_v60, %v1158_v53 }
 0x144   : > { %v734_v33 = vadd.f32 %v710_v9, %v636_v5  ;;  %v477_v57 = vadd.f32 %v476_v59, %v2730_v18 }
 0x145   : > { %v818_v37 = vpop.f32.mrf.mxu0  ;;  %1023 = vmatmul.f32.gmra.mxu2 %v2750_v34  ;;  %v849_v34 = vrot.slane %v2771_v29, 2 }
 0x146   : > { %v2886_v3 = vadd.f32 %v818_v37, %v734_v33  ;;  %925 = vmatmul.f32.gmra.mxu1 %v2761_v41  ;;  %v1054_v41 = vsel %vm281_vm0, %v1052_v14, %v1053_v27 }
 0x147   : > { %v850_v54 = vsel %vm485_vm1, %v847_v20, %v849_v34  ;;  %v830_v20 = vadd.f32 %v2787_v55, %v2785_v39 }
 0x148   : > { %1131 = vmatmul.f32.gmra.mxu3 %v2780_v0  ;;  %1233 = vmatmul.f32.gmra.mxu0 %v848_v22  ;;  %v615_v19 = vpop.f32.mrf.mxu2  ;;  %v240_v0 = vld [vmem:[%s2039_s6 + $0xe8] sm:$0x3]  ;;  %s2911_s6 = sand.u32 1, %s1880_s13  }
 0x149   : > { %v637_v21 = vadd.f32 %v615_v19, %v477_v57  ;;  %v1055_v4 = vrot.slane %v240_v0, 1  ;;  %v1160_v12 = vrot.slane %v240_v0, 2  ;;  %s1504_s21 = sshll.u32 %s2911_s6, 7  ;;  %s1340_s20 = scalar_lea.sflag [#allocation3], %s2911_s6 }
 0x14a   : > { %s2916_s24 = scalar_lea.vmem [#allocation2], %s1504_s21  ;;  %s1792_s21 = sshra.s32 %s1363_s10, 4  ;;  %s1793_s21 = int_to_ptr.hbm [resolvable:$true] %s1792_s21 }
 0x14b   : > { %v479_v35 = vpop.f32.mrf.mxu1  ;;  %v713_v2 = vpop.f32.mrf.mxu3  ;;  %v1056_v44 = vsel %vm281_vm0, %v1053_v27, %v1055_v4  ;;  %v1161_v9 = vsel %vm485_vm1, %v1158_v53, %v1160_v12  ;;  %s1360_s9 = sshll.u32 %s2916_s24, 4  ;;  %s1794_s27 = scalar_lea.hbm %s1793_s21, 128  ;;  %s1361_s9 = int_to_ptr.vmem [resolvable:$true] %s1360_s9 }
 0x14c   : > { %v735_v31 = vadd.f32 %v713_v2, %v637_v21  ;;  %v480_v28 = vadd.f32 %v479_v35, %v2754_v16  ;;  %v3023_v16 = vld [vmem:[#allocation8_spill] sm:$0xff]  ;;  %v831_v21 = vadd.f32 %v2795_v56, %v2793_v49  ;;  %p1795_p0 = scmp.ne.s32.totalorder %s1793_s21, %s1794_s27  ;;  %p1799_p4 = scmp.lt.s32.totalorder %s1793_s21, %s3018_s2 }
 0x14d   : > { %v821_v48 = vpop.f32.mrf.mxu0  ;;  %1026 = vmatmul.f32.gmra.mxu2 %v238_v61  ;;  %p1800_p5 = scmp.lt.s32.totalorder %s1798_s4, %s1794_s27 }
 0x14e   : > { %v2896_v18 = vadd.f32 %v821_v48, %v735_v31  ;;  %928 = vmatmul.f32.gmra.mxu1 %v848_v22  ;;  %v832_v48 = vadd.f32 %v2803_v43, %v2801_v51  ;;  %p1796_p1 = pnand %p1795_p0, %p1979_p3 }
 0x14f   : > { %p1801_p6 = por %p1800_p5, %p1799_p4 }
 0x150   : > { %1134 = vmatmul.f32.gmra.mxu3 %v1054_v41  ;;  %1236 = vmatmul.f32.gmra.mxu0 %v850_v54  ;;  %v618_v47 = vpop.f32.mrf.mxu2  ;;  %p1797_p2 = pneg %p1796_p1 }
 0x151   : > { %v638_v29 = vadd.f32 %v618_v47, %v480_v28 }
 0x152   : > { %p1802_p7 = pnand %p1801_p6, %p1797_p2 }
 0x153   : > { %v482_v8 = vpop.f32.mrf.mxu1  ;;  %v716_v62 = vpop.f32.mrf.mxu3 }
 0x154   : > { %v736_v32 = vadd.f32 %v716_v62, %v638_v29  ;;  %v483_v25 = vadd.f32 %v482_v8, %v3023_v16  ;;  %v833_v62 = vadd.f32 %v2811_v13, %v2809_v10 }
 0x155   : > { %v824_v11 = vpop.f32.mrf.mxu0  ;;  %1029 = vmatmul.f32.gmra.mxu2 %v239_v40 }
 0x156   : > { %v2902_v52 = vadd.f32 %v824_v11, %v736_v32  ;;  %931 = vmatmul.f32.gmra.mxu1 %v850_v54 }
 0x158   : > { %1137 = vmatmul.f32.gmra.mxu3 %v1056_v44  ;;  %1239 = vmatmul.f32.gmra.mxu0 %v1159_v46  ;;  %v621_v45 = vpop.f32.mrf.mxu2 }
 0x159   : > { %v639_v7 = vadd.f32 %v621_v45, %v483_v25 }
 0x15b   : > { %v719_v24 = vpop.f32.mrf.mxu3  ;;  %v887_v5 = vpop.f32.mrf.mxu1 }
 0x15c   : > { %v737_v42 = vadd.f32 %v719_v24, %v639_v7  ;;  %v935_v37 = vadd.f32 %v887_v5, %v830_v20  ;;  %v834_v24 = vadd.f32 %v2820_v36, %v2818_v30 }
 0x15d   : > { %v827_v59 = vpop.f32.mrf.mxu0 }
 0x15e   : > { %v2908_v33 = vadd.f32 %v827_v59, %v737_v42 }
 0x160   : > { %1242 = vmatmul.f32.gmra.mxu0 %v1161_v9  ;;  %v985_v22 = vpop.f32.mrf.mxu2 }
 0x161   : > { %v1033_v61 = vadd.f32 %v985_v22, %v935_v37 }
 0x163   : > { %v890_v40 = vpop.f32.mrf.mxu1  ;;  %v1093_v57 = vpop.f32.mrf.mxu3 }
 0x164   : > { %v1141_v19 = vadd.f32 %v1093_v57, %v1033_v61  ;;  %v936_v14 = vadd.f32 %v890_v40, %v831_v21  ;;  %v835_v57 = vadd.f32 %v2829_v17, %v2827_v15 }
 0x165   : > { %v1198_v55 = vpop.f32.mrf.mxu0 }
 0x166   : > { %v1246_v39 = vadd.f32 %v1198_v55, %v1141_v19 }
 0x168   : > { %1262 = vst [vmem:[%s2916_s24] sm:$0xff] %v1246_v39  ;;  %v988_v27 = vpop.f32.mrf.mxu2  ;;  %v1299_v56 = vmul.f32 %v1246_v39, %v1246_v39 }
 0x169   : > { %v1034_v34 = vadd.f32 %v988_v27, %v936_v14 }
 0x16b   : > { %v893_v35 = vpop.f32.mrf.mxu1  ;;  %v1096_v2 = vpop.f32.mrf.mxu3 }
 0x16c   : > { %v1142_v31 = vadd.f32 %v1096_v2, %v1034_v34  ;;  %v937_v49 = vadd.f32 %v893_v35, %v832_v48 }
 0x16d   : > { %v1201_v41 = vpop.f32.mrf.mxu0 }
 0x16e   : > { %v1247_v54 = vadd.f32 %v1201_v41, %v1142_v31  ;;  %v836_v31 = vadd.f32 %v2838_v38, %v2836_v26 }
 0x170   : > { %1263 = vst [vmem:[%s2916_s24 + $0x8] sm:$0xff] %v1247_v54  ;;  %v1278_v0 = vadd.f32 %v1247_v54, %v1246_v39  ;;  %v1300_v28 = vmul.f32 %v1247_v54, %v1247_v54  ;;  %v991_v47 = vpop.f32.mrf.mxu2 }
 0x171   : > { %v1035_v60 = vadd.f32 %v991_v47, %v937_v49 }
 0x172   : > { %v1315_v29 = vadd.f32 %v1300_v28, %v1299_v56 }
 0x173   : > { %v896_v4 = vpop.f32.mrf.mxu1  ;;  %v1099_v53 = vpop.f32.mrf.mxu3 }
 0x174   : > { %v1143_v8 = vadd.f32 %v1099_v53, %v1035_v60  ;;  %v938_v43 = vadd.f32 %v896_v4, %v833_v62 }
 0x175   : > { %v1204_v32 = vpop.f32.mrf.mxu0 }
 0x176   : > { %v1248_v51 = vadd.f32 %v1204_v32, %v1143_v8 }
 0x178   : > { %1264 = vst [vmem:[%s2916_s24 + $0x10] sm:$0xff] %v1248_v51  ;;  %v1279_v11 = vadd.f32 %v1278_v0, %v1248_v51  ;;  %v1301_v44 = vmul.f32 %v1248_v51, %v1248_v51  ;;  %v994_v46 = vpop.f32.mrf.mxu2 }
 0x179   : > { %v1036_v16 = vadd.f32 %v994_v46, %v938_v43 }
 0x17a   : > { %v1316_v25 = vadd.f32 %v1315_v29, %v1301_v44  ;;  %v837_v29 = vadd.f32 %v2847_v63, %v2845_v23 }
 0x17b   : > { %v899_v45 = vpop.f32.mrf.mxu1  ;;  %v1102_v7 = vpop.f32.mrf.mxu3 }
 0x17c   : > { %v1144_v12 = vadd.f32 %v1102_v7, %v1036_v16  ;;  %v939_v10 = vadd.f32 %v899_v45, %v834_v24 }
 0x17d   : > { %v1207_v5 = vpop.f32.mrf.mxu0 }
 0x17e   : > { %v1249_v42 = vadd.f32 %v1207_v5, %v1144_v12 }
 0x180   : > { %1265 = vst [vmem:[%s2916_s24 + $0x18] sm:$0xff] %v1249_v42  ;;  %v1280_v13 = vadd.f32 %v1279_v11, %v1249_v42  ;;  %v1302_v20 = vmul.f32 %v1249_v42, %v1249_v42  ;;  %v997_v59 = vpop.f32.mrf.mxu2 }
 0x181   : > { %v1037_v9 = vadd.f32 %v997_v59, %v939_v10 }
 0x182   : > { %v1317_v37 = vadd.f32 %v1316_v25, %v1302_v20 }
 0x183   : > { %v902_v22 = vpop.f32.mrf.mxu1  ;;  %v1105_v61 = vpop.f32.mrf.mxu3 }
 0x184   : > { %v1145_v40 = vadd.f32 %v1105_v61, %v1037_v9  ;;  %v940_v30 = vadd.f32 %v902_v22, %v835_v57 }
 0x185   : > { %v1210_v19 = vpop.f32.mrf.mxu0 }
 0x186   : > { %v1250_v21 = vadd.f32 %v1210_v19, %v1145_v40 }
 0x188   : > { %1266 = vst [vmem:[%s2916_s24 + $0x20] sm:$0xff] %v1250_v21  ;;  %v1281_v36 = vadd.f32 %v1280_v13, %v1250_v21  ;;  %v1303_v55 = vmul.f32 %v1250_v21, %v1250_v21  ;;  %v1000_v39 = vpop.f32.mrf.mxu2 }
 0x189   : > { %v1038_v14 = vadd.f32 %v1000_v39, %v940_v30 }
 0x18a   : > { %v1318_v27 = vadd.f32 %v1317_v37, %v1303_v55 }
 0x18b   : > { %v905_v34 = vpop.f32.mrf.mxu1  ;;  %v1108_v35 = vpop.f32.mrf.mxu3 }
 0x18c   : > { %v1146_v2 = vadd.f32 %v1108_v35, %v1038_v14  ;;  %v941_v15 = vadd.f32 %v905_v34, %v836_v31 }
 0x18d   : > { %v1213_v48 = vpop.f32.mrf.mxu0 }
 0x18e   : > { %v1251_v41 = vadd.f32 %v1213_v48, %v1146_v2 }
 0x190   : > { %1267 = vst [vmem:[%s2916_s24 + $0x28] sm:$0xff] %v1251_v41  ;;  %v1282_v17 = vadd.f32 %v1281_v36, %v1251_v41  ;;  %v1304_v54 = vmul.f32 %v1251_v41, %v1251_v41  ;;  %v1003_v49 = vpop.f32.mrf.mxu2 }
 0x191   : > { %v1039_v56 = vadd.f32 %v1003_v49, %v941_v15 }
 0x192   : > { %v1319_v0 = vadd.f32 %v1318_v27, %v1304_v54 }
 0x193   : > { %v908_v28 = vpop.f32.mrf.mxu1  ;;  %v1111_v47 = vpop.f32.mrf.mxu3 }
 0x194   : > { %v1147_v60 = vadd.f32 %v1111_v47, %v1039_v56  ;;  %v942_v26 = vadd.f32 %v908_v28, %v837_v29 }
 0x195   : > { %v1216_v4 = vpop.f32.mrf.mxu0 }
 0x196   : > { %v1252_v53 = vadd.f32 %v1216_v4, %v1147_v60 }
 0x198   : > { %1268 = vst [vmem:[%s2916_s24 + $0x30] sm:$0xff] %v1252_v53  ;;  %v1283_v38 = vadd.f32 %v1282_v17, %v1252_v53  ;;  %v1305_v8 = vmul.f32 %v1252_v53, %v1252_v53  ;;  %v1006_v62 = vpop.f32.mrf.mxu2 }
 0x199   : > { %v1040_v32 = vadd.f32 %v1006_v62, %v942_v26 }
 0x19a   : > { %v1320_v51 = vadd.f32 %v1319_v0, %v1305_v8 }
 0x19b   : > { %v911_v43 = vpop.f32.mrf.mxu1  ;;  %v1114_v11 = vpop.f32.mrf.mxu3 }
 0x19c   : > { %v1148_v44 = vadd.f32 %v1114_v11, %v1040_v32  ;;  %v943_v25 = vadd.f32 %v911_v43, %v2855_v50 }
 0x19d   : > { %v1219_v46 = vpop.f32.mrf.mxu0 }
 0x19e   : > { %v1253_v16 = vadd.f32 %v1219_v46, %v1148_v44 }
 0x1a0   : > { %1269 = vst [vmem:[%s2916_s24 + $0x38] sm:$0xff] %v1253_v16  ;;  %v1284_v23 = vadd.f32 %v1283_v38, %v1253_v16  ;;  %v1306_v63 = vmul.f32 %v1253_v16, %v1253_v16  ;;  %v1009_v45 = vpop.f32.mrf.mxu2 }
 0x1a1   : > { %v1041_v7 = vadd.f32 %v1009_v45, %v943_v25 }
 0x1a2   : > { %v1321_v12 = vadd.f32 %v1320_v51, %v1306_v63 }
 0x1a3   : > { %v914_v24 = vpop.f32.mrf.mxu1  ;;  %v1117_v5 = vpop.f32.mrf.mxu3 }
 0x1a4   : > { %v1149_v42 = vadd.f32 %v1117_v5, %v1041_v7  ;;  %v944_v20 = vadd.f32 %v914_v24, %v2862_v1 }
 0x1a5   : > { %v1222_v10 = vpop.f32.mrf.mxu0 }
 0x1a6   : > { %v1254_v13 = vadd.f32 %v1222_v10, %v1149_v42 }
 0x1a8   : > { %1270 = vst [vmem:[%s2916_s24 + $0x40] sm:$0xff] %v1254_v13  ;;  %v1285_v59 = vadd.f32 %v1284_v23, %v1254_v13  ;;  %v1307_v9 = vmul.f32 %v1254_v13, %v1254_v13  ;;  %v1012_v37 = vpop.f32.mrf.mxu2 }
 0x1a9   : > { %v1042_v22 = vadd.f32 %v1012_v37, %v944_v20 }
 0x1aa   : > { %v1322_v50 = vadd.f32 %v1321_v12, %v1307_v9 }
 0x1ab   : > { %v917_v61 = vpop.f32.mrf.mxu1  ;;  %v1120_v40 = vpop.f32.mrf.mxu3 }
 0x1ac   : > { %v1150_v57 = vadd.f32 %v1120_v40, %v1042_v22  ;;  %v945_v30 = vadd.f32 %v917_v61, %v2869_v58 }
 0x1ad   : > { %v1225_v19 = vpop.f32.mrf.mxu0 }
 0x1ae   : > { %v1255_v21 = vadd.f32 %v1225_v19, %v1150_v57 }
 0x1b0   : > { %1271 = vst [vmem:[%s2916_s24 + $0x48] sm:$0xff] %v1255_v21  ;;  %v1286_v36 = vadd.f32 %v1285_v59, %v1255_v21  ;;  %v1308_v55 = vmul.f32 %v1255_v21, %v1255_v21  ;;  %v1015_v39 = vpop.f32.mrf.mxu2 }
 0x1b1   : > { %v1043_v14 = vadd.f32 %v1015_v39, %v945_v30 }
 0x1b2   : > { %v1323_v1 = vadd.f32 %v1322_v50, %v1308_v55 }
 0x1b3   : > { %v920_v27 = vpop.f32.mrf.mxu1  ;;  %v1123_v34 = vpop.f32.mrf.mxu3 }
 0x1b4   : > { %v1151_v35 = vadd.f32 %v1123_v34, %v1043_v14  ;;  %v946_v48 = vadd.f32 %v920_v27, %v2876_v6 }
 0x1b5   : > { %v1228_v2 = vpop.f32.mrf.mxu0 }
 0x1b6   : > { %v1256_v31 = vadd.f32 %v1228_v2, %v1151_v35 }
 0x1b8   : > { %1272 = vst [vmem:[%s2916_s24 + $0x50] sm:$0xff] %v1256_v31  ;;  %v1287_v41 = vadd.f32 %v1286_v36, %v1256_v31  ;;  %v1309_v15 = vmul.f32 %v1256_v31, %v1256_v31  ;;  %v1018_v17 = vpop.f32.mrf.mxu2 }
 0x1b9   : > { %v1044_v54 = vadd.f32 %v1018_v17, %v946_v48 }
 0x1ba   : > { %v1324_v58 = vadd.f32 %v1323_v1, %v1309_v15 }
 0x1bb   : > { %v923_v49 = vpop.f32.mrf.mxu1  ;;  %v1126_v56 = vpop.f32.mrf.mxu3 }
 0x1bc   : > { %v1152_v0 = vadd.f32 %v1126_v56, %v1044_v54  ;;  %v947_v60 = vadd.f32 %v923_v49, %v2886_v3 }
 0x1bd   : > { %v1231_v28 = vpop.f32.mrf.mxu0 }
 0x1be   : > { %v1257_v47 = vadd.f32 %v1231_v28, %v1152_v0 }
 0x1c0   : > { %1273 = vst [vmem:[%s2916_s24 + $0x58] sm:$0xff] %v1257_v47  ;;  %v1288_v29 = vadd.f32 %v1287_v41, %v1257_v47  ;;  %v1310_v4 = vmul.f32 %v1257_v47, %v1257_v47  ;;  %v1021_v53 = vpop.f32.mrf.mxu2 }
 0x1c1   : > { %v1045_v26 = vadd.f32 %v1021_v53, %v947_v60 }
 0x1c2   : > { %v1325_v6 = vadd.f32 %v1324_v58, %v1310_v4 }
 0x1c3   : > { %v926_v38 = vpop.f32.mrf.mxu1  ;;  %v1129_v8 = vpop.f32.mrf.mxu3 }
 0x1c4   : > { %v1153_v62 = vadd.f32 %v1129_v8, %v1045_v26  ;;  %v948_v43 = vadd.f32 %v926_v38, %v2896_v18 }
 0x1c5   : > { %v1234_v32 = vpop.f32.mrf.mxu0 }
 0x1c6   : > { %v1258_v51 = vadd.f32 %v1234_v32, %v1153_v62 }
 0x1c8   : > { %1274 = vst [vmem:[%s2916_s24 + $0x60] sm:$0xff] %v1258_v51  ;;  %v1289_v11 = vadd.f32 %v1288_v29, %v1258_v51  ;;  %v1311_v44 = vmul.f32 %v1258_v51, %v1258_v51  ;;  %v1024_v3 = vpop.f32.mrf.mxu2 }
 0x1c9   : > { %v1046_v46 = vadd.f32 %v1024_v3, %v948_v43 }
 0x1ca   : > { %v1326_v16 = vadd.f32 %v1325_v6, %v1311_v44 }
 0x1cb   : > { %v929_v25 = vpop.f32.mrf.mxu1  ;;  %v1132_v23 = vpop.f32.mrf.mxu3 }
 0x1cc   : > { %v1154_v63 = vadd.f32 %v1132_v23, %v1046_v46  ;;  %v949_v12 = vadd.f32 %v929_v25, %v2902_v52 }
 0x1cd   : > { %v1237_v45 = vpop.f32.mrf.mxu0 }
 0x1ce   : > { %v1259_v7 = vadd.f32 %v1237_v45, %v1154_v63 }
 0x1d0   : > { %1275 = vst [vmem:[%s2916_s24 + $0x68] sm:$0xff] %v1259_v7  ;;  %v1290_v24 = vadd.f32 %v1289_v11, %v1259_v7  ;;  %v1312_v5 = vmul.f32 %v1259_v7, %v1259_v7  ;;  %v1027_v18 = vpop.f32.mrf.mxu2 }
 0x1d1   : > { %v1047_v42 = vadd.f32 %v1027_v18, %v949_v12 }
 0x1d2   : > { %v1327_v10 = vadd.f32 %v1326_v16, %v1312_v5 }
 0x1d3   : > { %v1135_v13 = vpop.f32.mrf.mxu3  ;;  %v932_v20 = vpop.f32.mrf.mxu1 }
 0x1d4   : > { %v1155_v59 = vadd.f32 %v1135_v13, %v1047_v42  ;;  %v950_v22 = vadd.f32 %v932_v20, %v2908_v33 }
 0x1d5   : > { %v1240_v9 = vpop.f32.mrf.mxu0 }
 0x1d6   : > { %v1260_v37 = vadd.f32 %v1240_v9, %v1155_v59 }
 0x1d8   : > { %1276 = vst [vmem:[%s2916_s24 + $0x70] sm:$0xff] %v1260_v37  ;;  %v1291_v52 = vadd.f32 %v1290_v24, %v1260_v37  ;;  %v1313_v50 = vmul.f32 %v1260_v37, %v1260_v37  ;;  %v1030_v61 = vpop.f32.mrf.mxu2 }
 0x1d9   : > { %v1048_v40 = vadd.f32 %v1030_v61, %v950_v22 }
 0x1da   : > { %v1328_v57 = vadd.f32 %v1327_v10, %v1313_v50 }
 0x1db   : > { %v1138_v19 = vpop.f32.mrf.mxu3 }
 0x1dc   : > { %v1156_v21 = vadd.f32 %v1138_v19, %v1048_v40 }
 0x1dd   : > { %v1243_v30 = vpop.f32.mrf.mxu0 }
 0x1de   : > { %v1261_v33 = vadd.f32 %v1243_v30, %v1156_v21 }
 0x1e0   : > { %1277 = vst [vmem:[%s2916_s24 + $0x78] sm:$0xff] %v1261_v33  ;;  %v1292_v36 = vadd.f32 %v1291_v52, %v1261_v33  ;;  %v1314_v55 = vmul.f32 %v1261_v33, %v1261_v33 }
 0x1e1   : > { %1805 = shalt.err (!%p1802_p7)
}
 0x1e2   : > { %s1906_s16 = smov 128   ;;  %s1907_s24 = smov 8   ;;  %v1293_v39 = vrot.slane %v1292_v36, 4  ;;  %v1329_v14 = vadd.f32 %v1328_v57, %v1314_v55  ;;  %vm1336_vm2 = vcmask 1040384  }
 0x1e3   : > { %1696 = dma.vmem_to_hbm [thread:$0]  (%p1979_p3), %s1361_s9, 2048, %s1363_s10, %s1340_s20, %s1906_s16, %s1906_s16, %s1907_s24  }
 0x1e4   : > { %s1375_s8 = sadd.s32 %s1888_s15, %s1641_s11  ;;  %v1294_v1 = vadd.f32 %v1293_v39, %v1292_v36  ;;  %v1330_v27 = vrot.slane %v1329_v14, 4  ;;  %s1505_s28 = sshll.u32 %s2911_s6, 1 }
 0x1e5   : > { %s1642_s21 = sshll.u32 %s1375_s8, 1  ;;  %s200_s9 = scalar_lea.vmem [#allocation4], %s1505_s28 }
 0x1e6   : > { %v1295_v34 = vrot.slane %v1294_v1, 2  ;;  %v1331_v35 = vadd.f32 %v1330_v27, %v1329_v14  ;;  %s1377_s4 = scalar_lea.hbm %s3019_s3, %s1642_s21  ;;  %s1379_s10 = sshll.u32 %s200_s9, 4  ;;  %s1380_s10 = int_to_ptr.vmem [resolvable:$true] %s1379_s10 }
 0x1e7   : > { %s1381_s15 = sshll.u32 %s1377_s4, 4  ;;  %s1345_s11 = scalar_lea.sflag [#allocation5], %s2911_s6  ;;  %s1382_s15 = int_to_ptr.hbm [resolvable:$true] %s1381_s15 }
 0x1e8   : > { %v1296_v2 = vadd.f32 %v1295_v34, %v1294_v1  ;;  %v1332_v31 = vrot.slane %v1331_v35, 2  ;;  %s1820_s20 = sshra.s32 %s1382_s15, 4  ;;  %s1826_s24 = scalar_lea.hbm %s3019_s3, 8  ;;  %s1821_s20 = int_to_ptr.hbm [resolvable:$true] %s1820_s20 }
 0x1e9   : > { %s1822_s5 = scalar_lea.hbm %s1821_s20, 2  ;;  %p1827_p12 = scmp.lt.s32.totalorder %s1821_s20, %s3019_s3 }
 0x1ea   : > { %v1297_v48 = vrot.slane %v1296_v2, 1  ;;  %v1333_v41 = vadd.f32 %v1332_v31, %v1331_v35  ;;  %p1823_p9 = scmp.ne.s32.totalorder %s1821_s20, %s1822_s5  ;;  %p1828_p13 = scmp.lt.s32.totalorder %s1826_s24, %s1822_s5 }
 0x1ec   : > { %v1334_v15 = vrot.slane %v1333_v41, 1  ;;  %v1298_v17 = vadd.f32 %v1297_v48, %v1296_v2  ;;  %p1824_p10 = pnand %p1823_p9, %p1979_p3  ;;  %p1829_p0 = por %p1828_p13, %p1827_p12 }
 0x1ee   : > { %v1335_v54 = vadd.f32 %v1334_v15, %v1333_v41  ;;  %p1825_p11 = pneg %p1824_p10 }
 0x1f0   : > { %v1337_v58 = vsel %vm1336_vm2, %v1298_v17, %v1335_v54  ;;  %p1830_p1 = pnand %p1829_p0, %p1825_p11 }
 0x1f1   : > { %1338 = vst [vmem:[%s200_s9] sm:$0x3] %v1337_v58 }
 0x1f2   : > { %1833 = shalt.err (!%p1830_p1)
}
 0x1f3   : > { %1697 = dma.vmem_to_hbm [thread:$0]  (%p1979_p3), %s1380_s10, 32, %s1382_s15, %s1345_s11  }
 0x1f4 PF: > { %p1707_p2 = scmp.ge.s32.totalorder %s1904_s19, 2  ;;  %s1393_s6 = sand.u32 1, %s1876_s12  }
 0x1f5   : > { %s1394_s21 = scalar_lea.sflag [#allocation3], %s1393_s6 }
 0x1f6   : > { %p1701_p4 = pnand %p1707_p2, %p1988_p8 }
 0x1f8   : > { %p1702_p5 = pneg %p1701_p4 }
 0x1fa   : > { %1867 = dma.done.wait (%p1702_p5), %s1394_s21, 2048  }
 0x1fb   : > { %1869 = vsyncadd (%p1702_p5), %s1394_s21, 4294965248  ;;  %s1404_s27 = scalar_lea.sflag [#allocation5], %s1393_s6 }
 0x1fc   : > { %1871 = dma.done.wait (%p1702_p5), %s1404_s27, 32  }
 0x1fd   : > { %1873 = vsyncadd (%p1702_p5), %s1404_s27, 4294967264  ;;  %s20_s19 = sadd.s32 1, %s1904_s19   ;;  %s3024_s12 = smov %s1880_s13 }
 0x1fe   : > { %p17_p6 = scmp.ge.s32.totalorder %s20_s19, 6   ;;  %s3025_s13 = smov %s1884_s14 }
 0x1ff   : > { %s3026_s14 = smov %s1997_s30  ;;  %s3027_s15 = smov %s1896_s17 }
 0x200   : > { %s3028_s16 = smov %s1900_s18  ;;  %s3029_s17 = smov %s3032_s22 }
 0x201   : > { %s3030_s18 = smov %s3036_s23  ;;  %19 = sbr.rel (!%p17_p6) target bundleno = 7 (0x7), region = 88 }
 0x206   :  { %1410 = vsyncpa [#allocation3], 1 }
 0x207   :  { %1412 = vsyncpa [#allocation3 + $0x1], 1 }
 0x208   :  { %1413 = vsyncpa [#allocation5], 1 }
 0x209   :  { %1415 = vsyncpa [#allocation5 + $0x1], 1 }

</bundles_post_ra>
